<compile_context>
chip_gen: v6e
topology: v6e:2x2x1
jax: 0.10.0
libtpu: 0.0.40
codegen_flags: <defaults>
</compile_context>

<pallas_src>
import functools
import math

import jax
import jax.numpy as jnp
from jax.experimental import pallas as pl
from jax.experimental.pallas import tpu as pltpu


# ----------------------------------------------------------------------------
# Tile choosers (keep blocks legal: last two dims divisible by (8, 128) or full)
# ----------------------------------------------------------------------------
def _row_tile_2d(ho, f, c, w, itemsize, max_rows=32):
    """Output rows (THo) per grid step for the 2D kernels.

    Either THo == Ho (full extent) or THo is a multiple of 8 dividing Ho, so the
    (THo*f, W) input block and (THo, Wo) output block satisfy TPU constraints.
    """
    if ho % 8 != 0 or ho <= max_rows:
        return ho
    best = 8
    for cand in range(8, min(ho, max_rows) + 1, 8):
        if ho % cand == 0 and c * cand * f * w * itemsize <= 4 * 1024 * 1024:
            best = cand
    return best


def _lane_tile_1d(length, f, c, itemsize):
    """Input-length tile (TL) for the 1D kernels: multiple of 128*f dividing L, or full L."""
    unit = 128 * f
    if length % unit != 0:
        return length
    best = unit
    for cand in range(unit, length + 1, unit):
        if (length % cand == 0
                and c * cand * itemsize <= 4 * 1024 * 1024
                and cand * (cand // f) * 4 <= 2 * 1024 * 1024):
            best = cand
    return best


# ----------------------------------------------------------------------------
# Pallas kernels
# ----------------------------------------------------------------------------
def _conv2d_kernel(x_ref, w_ref, b_ref, o_ref, *, f):
    # x_ref: (1, C, THo*f, W)   w_ref: (f*f, Co, C)   b_ref: (Co, 1)
    # o_ref: (1, Co, THo, Wo)
    tho = o_ref.shape[2]
    wo = o_ref.shape[3]
    w_in = x_ref.shape[3]
    in_dt = x_ref.dtype

    # Lane-selection matrices (one per column tap j), built from iota in VMEM.
    rows = jax.lax.broadcasted_iota(jnp.int32, (w_in, wo), 0)
    cols = jax.lax.broadcasted_iota(jnp.int32, (w_in, wo), 1)
    sels = [(rows == f * cols + j).astype(in_dt) for j in range(f)]

    # Weights / bias are resident; hoist the reads out of the loops.
    wts = [w_ref[t].astype(jnp.float32) for t in range(f * f)]
    bias = b_ref[...].astype(jnp.float32)                       # (Co, 1)

    for r in range(tho):                                        # static unroll
        acc = None
        for i in range(f):
            xr = x_ref[0, :, r * f + i, :]                      # (C, W), input dtype
            for j in range(f):
                a = jnp.dot(xr, sels[j],
                            preferred_element_type=jnp.float32)           # (C, Wo)
                contrib = jnp.dot(wts[i * f + j], a,
                                  preferred_element_type=jnp.float32)     # (Co, Wo)
                acc = contrib if acc is None else acc + contrib
        o_ref[0, :, r, :] = (acc + bias).astype(o_ref.dtype)


def _pool2d_kernel(x_ref, o_ref, *, f):
    # x_ref: (1, C, THo*f, W)   o_ref: (1, C, THo, Wo)
    tho = o_ref.shape[2]
    wo = o_ref.shape[3]
    w_in = x_ref.shape[3]
    rows = jax.lax.broadcasted_iota(jnp.int32, (w_in, wo), 0)
    cols = jax.lax.broadcasted_iota(jnp.int32, (w_in, wo), 1)
    sel = ((rows // f) == cols).astype(jnp.float32) * (1.0 / float(f * f))
    for r in range(tho):                                        # static unroll
        acc = x_ref[0, :, r * f, :].astype(jnp.float32)         # (C, W)
        for i in range(1, f):
            acc = acc + x_ref[0, :, r * f + i, :].astype(jnp.float32)
        o_ref[0, :, r, :] = jnp.dot(
            acc, sel, preferred_element_type=jnp.float32).astype(o_ref.dtype)


def _conv1d_kernel(x_ref, w_ref, b_ref, o_ref, *, f):
    # x_ref: (1, C, TL)   w_ref: (f, Co, C)   b_ref: (Co, 1)   o_ref: (1, Co, TLo)
    tl = x_ref.shape[2]
    tlo = o_ref.shape[2]
    in_dt = x_ref.dtype
    rows = jax.lax.broadcasted_iota(jnp.int32, (tl, tlo), 0)
    cols = jax.lax.broadcasted_iota(jnp.int32, (tl, tlo), 1)
    x = x_ref[0]                                                # (C, TL)
    bias = b_ref[...].astype(jnp.float32)                       # (Co, 1)
    acc = None
    for j in range(f):
        sel = (rows == f * cols + j).astype(in_dt)
        a = jnp.dot(x, sel, preferred_element_type=jnp.float32)             # (C, TLo)
        contrib = jnp.dot(w_ref[j].astype(jnp.float32), a,
                          preferred_element_type=jnp.float32)               # (Co, TLo)
        acc = contrib if acc is None else acc + contrib
    o_ref[0] = (acc + bias).astype(o_ref.dtype)


def _pool1d_kernel(x_ref, o_ref, *, f):
    # x_ref: (1, C, TL)   o_ref: (1, C, TLo)
    tl = x_ref.shape[2]
    tlo = o_ref.shape[2]
    rows = jax.lax.broadcasted_iota(jnp.int32, (tl, tlo), 0)
    cols = jax.lax.broadcasted_iota(jnp.int32, (tl, tlo), 1)
    sel = ((rows // f) == cols).astype(jnp.float32) * (1.0 / float(f))
    o_ref[0] = jnp.dot(x_ref[0].astype(jnp.float32), sel,
                       preferred_element_type=jnp.float32).astype(o_ref.dtype)


# ----------------------------------------------------------------------------
# pallas_call wrappers (direct NCHW / NCL in and out)
# ----------------------------------------------------------------------------
def _downsample2d(x, f, w_taps=None, bias=None):
    B, C, H, W = x.shape
    Ho, Wo = H // f, W // f
    xc = x[:, :, :Ho * f, :Wo * f]          # no-op when divisible
    Wc = Wo * f
    itemsize = jnp.dtype(x.dtype).itemsize
    tho = _row_tile_2d(Ho, f, C, Wc, itemsize)
    grid = (B, Ho // tho)
    params = pltpu.CompilerParams(dimension_semantics=("parallel", "parallel"))

    if w_taps is None:  # average pooling
        return pl.pallas_call(
            functools.partial(_pool2d_kernel, f=f),
            out_shape=jax.ShapeDtypeStruct((B, C, Ho, Wo), x.dtype),
            grid_spec=pltpu.PrefetchScalarGridSpec(
                num_scalar_prefetch=0,
                grid=grid,
                in_specs=[pl.BlockSpec((1, C, tho * f, Wc),
                                       lambda b, t: (b, 0, t, 0))],
                out_specs=pl.BlockSpec((1, C, tho, Wo),
                                       lambda b, t: (b, 0, t, 0)),
            ),
            compiler_params=params,
        )(xc)

    Co = w_taps.shape[1]
    return pl.pallas_call(
        functools.partial(_conv2d_kernel, f=f),
        out_shape=jax.ShapeDtypeStruct((B, Co, Ho, Wo), x.dtype),
        grid_spec=pltpu.PrefetchScalarGridSpec(
            num_scalar_prefetch=0,
            grid=grid,
            in_specs=[
                pl.BlockSpec((1, C, tho * f, Wc), lambda b, t: (b, 0, t, 0)),
                pl.BlockSpec((f * f, Co, C), lambda b, t: (0, 0, 0)),
                pl.BlockSpec((Co, 1), lambda b, t: (0, 0)),
            ],
            out_specs=pl.BlockSpec((1, Co, tho, Wo), lambda b, t: (b, 0, t, 0)),
        ),
        compiler_params=params,
    )(xc, w_taps, bias)


def _downsample1d(x, f, w_taps=None, bias=None):
    B, C, L = x.shape
    Lo = L // f
    xc = x[:, :, :Lo * f]                   # no-op when divisible
    Lc = Lo * f
    itemsize = jnp.dtype(x.dtype).itemsize
    tl = _lane_tile_1d(Lc, f, C, itemsize)
    tlo = tl // f
    grid = (B, Lc // tl)
    params = pltpu.CompilerParams(dimension_semantics=("parallel", "parallel"))

    if w_taps is None:  # average pooling
        return pl.pallas_call(
            functools.partial(_pool1d_kernel, f=f),
            out_shape=jax.ShapeDtypeStruct((B, C, Lo), x.dtype),
            grid_spec=pltpu.PrefetchScalarGridSpec(
                num_scalar_prefetch=0,
                grid=grid,
                in_specs=[pl.BlockSpec((1, C, tl), lambda b, t: (b, 0, t))],
                out_specs=pl.BlockSpec((1, C, tlo), lambda b, t: (b, 0, t)),
            ),
            compiler_params=params,
        )(xc)

    Co = w_taps.shape[1]
    return pl.pallas_call(
        functools.partial(_conv1d_kernel, f=f),
        out_shape=jax.ShapeDtypeStruct((B, Co, Lo), x.dtype),
        grid_spec=pltpu.PrefetchScalarGridSpec(
            num_scalar_prefetch=0,
            grid=grid,
            in_specs=[
                pl.BlockSpec((1, C, tl), lambda b, t: (b, 0, t)),
                pl.BlockSpec((f, Co, C), lambda b, t: (0, 0, 0)),
                pl.BlockSpec((Co, 1), lambda b, t: (0, 0)),
            ],
            out_specs=pl.BlockSpec((1, Co, tlo), lambda b, t: (b, 0, t)),
        ),
        compiler_params=params,
    )(xc, w_taps, bias)


# ----------------------------------------------------------------------------
# Downsample module (JAX / Pallas)
# ----------------------------------------------------------------------------
class Downsample:
    def __init__(self, ch_in, ch_out=None, dividing_factor=2, mode="1D",
                 with_conv=False, key=None):
        self.dividing_factor = int(dividing_factor)
        self.ch_in = ch_in
        self.ch_out = ch_in if ch_out is None else ch_out
        self.mode = mode
        self.with_conv = with_conv
        if mode not in ("1D", "2D"):
            raise ValueError(f"Upsample mode {mode} is not supported.")
        if not with_conv:
            assert self.ch_out == self.ch_in

        f = self.dividing_factor
        ndim = 1 if mode == "1D" else 2
        ksize = f ** ndim

        if with_conv:
            # Deterministic init mimicking PyTorch Conv default:
            # uniform(-1/sqrt(fan_in), 1/sqrt(fan_in)); fan_in = ch_in * f^ndim
            if key is None:
                key = jax.random.PRNGKey(42)
            kw, kb = jax.random.split(key)
            fan_in = self.ch_in * ksize
            bound = 1.0 / math.sqrt(fan_in)
            wshape = (self.ch_out, self.ch_in) + (f,) * ndim      # PyTorch layout
            self.weight = jax.random.uniform(
                kw, wshape, minval=-bound, maxval=bound, dtype=jnp.float32)
            self.bias = jax.random.uniform(
                kb, (self.ch_out,), minval=-bound, maxval=bound, dtype=jnp.float32)
            if ndim == 2:
                # (Co, C, f, f) -> (f*f, Co, C): one (Co, C) channel-mix per tap
                self.w_taps = jnp.transpose(self.weight, (2, 3, 0, 1)).reshape(
                    f * f, self.ch_out, self.ch_in)
            else:
                # (Co, C, f) -> (f, Co, C)
                self.w_taps = jnp.transpose(self.weight, (2, 0, 1))
            self.b_mat = self.bias.reshape(self.ch_out, 1)
        else:
            self.weight = None
            self.bias = None
            self.w_taps = None
            self.b_mat = None

    def __call__(self, x: jax.Array) -> jax.Array:
        f = self.dividing_factor
        if self.mode == "2D":
            B, C, H, W = x.shape
            assert C == self.ch_in
            out = _downsample2d(x, f, self.w_taps, self.b_mat)
            assert out.shape == (B, self.ch_out, H // f, W // f)
            return out
        else:  # '1D'
            B, C, L = x.shape
            assert C == self.ch_in
            out = _downsample1d(x, f, self.w_taps, self.b_mat)
            assert out.shape == (B, self.ch_out, L // f)
            return out


# ----------------------------------------------------------------------------
# Pure-JAX references for sanity checking
# ----------------------------------------------------------------------------
def _ref_conv2d(x, w, b, f):
    out = jax.lax.conv_general_dilated(
        x, w, window_strides=(f, f), padding="VALID",
        dimension_numbers=("NCHW", "OIHW", "NCHW"))
    return out + b.reshape(1, -1, 1, 1)


def _ref_avgpool2d(x, f):
    B, C, H, W = x.shape
    Ho, Wo = H // f, W // f
    return x[:, :, :Ho * f, :Wo * f].reshape(B, C, Ho, f, Wo, f).mean(axis=(3, 5))


def _ref_conv1d(x, w, b, f):
    out = jax.lax.conv_general_dilated(
        x, w, window_strides=(f,), padding="VALID",
        dimension_numbers=("NCH", "OIH", "NCH"))
    return out + b.reshape(1, -1, 1)


def _ref_avgpool1d(x, f):
    B, C, L = x.shape
    Lo = L // f
    return x[:, :, :Lo * f].reshape(B, C, Lo, f).mean(axis=3)


if __name__ == "__main__":
    key = jax.random.PRNGKey(0)
    k1, k2, k3 = jax.random.split(key, 3)

    # ---- 2D, with_conv=True -------------------------------------------------
    x2d = jax.random.normal(k1, (2, 4, 16, 16), dtype=jnp.float32)
    ds_conv2d = Downsample(ch_in=4, ch_out=8, dividing_factor=2, mode="2D",
                           with_conv=True, key=k3)
    y_conv2d = jax.block_until_ready(ds_conv2d(x2d))
    y_ref = _ref_conv2d(x2d, ds_conv2d.weight, ds_conv2d.bias, 2)
    assert y_conv2d.shape == (2, 8, 8, 8)
    assert jnp.allclose(y_conv2d, y_ref, atol=1e-5, rtol=1e-5)

    # ---- 2D, with_conv=False (avg pool) -------------------------------------
    ds_pool2d = Downsample(ch_in=4, dividing_factor=2, mode="2D", with_conv=False)
    y_pool2d = jax.block_until_ready(ds_pool2d(x2d))
    assert y_pool2d.shape == (2, 4, 8, 8)
    assert jnp.allclose(y_pool2d, _ref_avgpool2d(x2d, 2), atol=1e-5, rtol=1e-5)

    # ---- 1D, with_conv=True -------------------------------------------------
    x1d = jax.random.normal(k2, (2, 4, 32), dtype=jnp.float32)
    ds_conv1d = Downsample(ch_in=4, ch_out=8, dividing_factor=2, mode="1D",
                           with_conv=True, key=k3)
    y_conv1d = jax.block_until_ready(ds_conv1d(x1d))
    assert y_conv1d.shape == (2, 8, 16)
    assert jnp.allclose(y_conv1d, _ref_conv1d(x1d, ds_conv1d.weight, ds_conv1d.bias, 2),
                        atol=1e-5, rtol=1e-5)

    # ---- 1D, with_conv=False (avg pool) -------------------------------------
    ds_pool1d = Downsample(ch_in=4, dividing_factor=2, mode="1D", with_conv=False)
    y_pool1d = jax.block_until_ready(ds_pool1d(x1d))
    assert y_pool1d.shape == (2, 4, 16)
    assert jnp.allclose(y_pool1d, _ref_avgpool1d(x1d, 2), atol=1e-5, rtol=1e-5)

    print("KERNEL_OK")
</pallas_src>

<mosaic_0001>
module attributes {stable_mosaic.version = 11 : i64} {
  func.func @_conv2d_kernel(%arg0: i32, %arg1: i32, %arg2: memref<1x4x16x16xf32, #tpu.memory_space<vmem>>, %arg3: memref<4x8x4xf32, #tpu.memory_space<vmem>>, %arg4: memref<8x1xf32, #tpu.memory_space<vmem>>, %arg5: memref<1x8x8x8xf32, #tpu.memory_space<vmem>>) attributes {dimension_semantics = [#tpu.dimension_semantics<parallel>, #tpu.dimension_semantics<parallel>], iteration_bounds = array<i64: 2, 1>, scalar_prefetch = 0 : i64, scratch_operands = 0 : i64, tpu.core_type = #tpu.core_type<tc>, window_params = [{transform_indices = @transform_0, window_bounds = array<i64: 1, 4, 16, 16>}, {pipeline_mode = #tpu.pipeline_mode<synchronous>, transform_indices = @transform_1, window_bounds = array<i64: 4, 8, 4>}, {pipeline_mode = #tpu.pipeline_mode<synchronous>, transform_indices = @transform_2, window_bounds = array<i64: 8, 1>}, {transform_indices = @transform_3, window_bounds = array<i64: 1, 8, 8, 8>}]} {
    %0 = tpu.iota {dimensions = array<i32: 0>} : vector<16x8xi32>
    %1 = tpu.iota {dimensions = array<i32: 1>} : vector<16x8xi32>
    %c2_i32 = arith.constant 2 : i32
    %2 = vector.broadcast %c2_i32 : i32 to vector<16x8xi32>
    %3 = arith.muli %2, %1 : vector<16x8xi32>
    %c0_i32 = arith.constant 0 : i32
    %4 = vector.broadcast %c0_i32 : i32 to vector<16x8xi32>
    %5 = arith.addi %3, %4 : vector<16x8xi32>
    %6 = arith.cmpi eq, %0, %5 : vector<16x8xi32>
    %7 = arith.extui %6 : vector<16x8xi1> to vector<16x8xi32>
    %8 = arith.sitofp %7 : vector<16x8xi32> to vector<16x8xf32>
    %c2_i32_0 = arith.constant 2 : i32
    %9 = vector.broadcast %c2_i32_0 : i32 to vector<16x8xi32>
    %10 = arith.muli %9, %1 : vector<16x8xi32>
    %c1_i32 = arith.constant 1 : i32
    %11 = vector.broadcast %c1_i32 : i32 to vector<16x8xi32>
    %12 = arith.addi %10, %11 : vector<16x8xi32>
    %13 = arith.cmpi eq, %0, %12 : vector<16x8xi32>
    %14 = arith.extui %13 : vector<16x8xi1> to vector<16x8xi32>
    %15 = arith.sitofp %14 : vector<16x8xi32> to vector<16x8xf32>
    %c0 = arith.constant 0 : index
    %c0_1 = arith.constant 0 : index
    %c0_2 = arith.constant 0 : index
    %16 = vector.load %arg3[%c0, %c0_1, %c0_2] : memref<4x8x4xf32, #tpu.memory_space<vmem>>, vector<1x8x4xf32>
    %17 = vector.shape_cast %16 : vector<1x8x4xf32> to vector<8x4xf32>
    %c1 = arith.constant 1 : index
    %c0_3 = arith.constant 0 : index
    %c0_4 = arith.constant 0 : index
    %18 = vector.load %arg3[%c1, %c0_3, %c0_4] : memref<4x8x4xf32, #tpu.memory_space<vmem>>, vector<1x8x4xf32>
    %19 = vector.shape_cast %18 : vector<1x8x4xf32> to vector<8x4xf32>
    %c2 = arith.constant 2 : index
    %c0_5 = arith.constant 0 : index
    %c0_6 = arith.constant 0 : index
    %20 = vector.load %arg3[%c2, %c0_5, %c0_6] : memref<4x8x4xf32, #tpu.memory_space<vmem>>, vector<1x8x4xf32>
    %21 = vector.shape_cast %20 : vector<1x8x4xf32> to vector<8x4xf32>
    %c3 = arith.constant 3 : index
    %c0_7 = arith.constant 0 : index
    %c0_8 = arith.constant 0 : index
    %22 = vector.load %arg3[%c3, %c0_7, %c0_8] : memref<4x8x4xf32, #tpu.memory_space<vmem>>, vector<1x8x4xf32>
    %23 = vector.shape_cast %22 : vector<1x8x4xf32> to vector<8x4xf32>
    %c0_9 = arith.constant 0 : index
    %c0_10 = arith.constant 0 : index
    %24 = vector.load %arg4[%c0_9, %c0_10] : memref<8x1xf32, #tpu.memory_space<vmem>>, vector<8x1xf32>
    %c0_11 = arith.constant 0 : index
    %c0_12 = arith.constant 0 : index
    %c0_13 = arith.constant 0 : index
    %c0_14 = arith.constant 0 : index
    %25 = vector.load %arg2[%c0_11, %c0_12, %c0_13, %c0_14] : memref<1x4x16x16xf32, #tpu.memory_space<vmem>>, vector<1x4x1x16xf32>
    %26 = vector.shape_cast %25 : vector<1x4x1x16xf32> to vector<4x16xf32>
    %cst = arith.constant dense<0.000000e+00> : vector<4x8xf32>
    %27 = tpu.matmul %26, %8, %cst {dimension_numbers = #tpu.dot_dimension_numbers<[1], [0], [0], [1], [0, 0, 1, 1], [], []>} : vector<4x16xf32>, vector<16x8xf32>, vector<4x8xf32> -> vector<4x8xf32>
    %cst_15 = arith.constant dense<0.000000e+00> : vector<8x8xf32>
    %28 = tpu.matmul %17, %27, %cst_15 {dimension_numbers = #tpu.dot_dimension_numbers<[1], [0], [0], [1], [0, 0, 1, 1], [], []>} : vector<8x4xf32>, vector<4x8xf32>, vector<8x8xf32> -> vector<8x8xf32>
    %cst_16 = arith.constant dense<0.000000e+00> : vector<4x8xf32>
    %29 = tpu.matmul %26, %15, %cst_16 {dimension_numbers = #tpu.dot_dimension_numbers<[1], [0], [0], [1], [0, 0, 1, 1], [], []>} : vector<4x16xf32>, vector<16x8xf32>, vector<4x8xf32> -> vector<4x8xf32>
    %cst_17 = arith.constant dense<0.000000e+00> : vector<8x8xf32>
    %30 = tpu.matmul %19, %29, %cst_17 {dimension_numbers = #tpu.dot_dimension_numbers<[1], [0], [0], [1], [0, 0, 1, 1], [], []>} : vector<8x4xf32>, vector<4x8xf32>, vector<8x8xf32> -> vector<8x8xf32>
    %31 = arith.addf %28, %30 : vector<8x8xf32>
    %c0_18 = arith.constant 0 : index
    %c0_19 = arith.constant 0 : index
    %c1_20 = arith.constant 1 : index
    %c0_21 = arith.constant 0 : index
    %32 = vector.load %arg2[%c0_18, %c0_19, %c1_20, %c0_21] : memref<1x4x16x16xf32, #tpu.memory_space<vmem>>, vector<1x4x1x16xf32>
    %33 = vector.shape_cast %32 : vector<1x4x1x16xf32> to vector<4x16xf32>
    %cst_22 = arith.constant dense<0.000000e+00> : vector<4x8xf32>
    %34 = tpu.matmul %33, %8, %cst_22 {dimension_numbers = #tpu.dot_dimension_numbers<[1], [0], [0], [1], [0, 0, 1, 1], [], []>} : vector<4x16xf32>, vector<16x8xf32>, vector<4x8xf32> -> vector<4x8xf32>
    %cst_23 = arith.constant dense<0.000000e+00> : vector<8x8xf32>
    %35 = tpu.matmul %21, %34, %cst_23 {dimension_numbers = #tpu.dot_dimension_numbers<[1], [0], [0], [1], [0, 0, 1, 1], [], []>} : vector<8x4xf32>, vector<4x8xf32>, vector<8x8xf32> -> vector<8x8xf32>
    %36 = arith.addf %31, %35 : vector<8x8xf32>
    %cst_24 = arith.constant dense<0.000000e+00> : vector<4x8xf32>
    %37 = tpu.matmul %33, %15, %cst_24 {dimension_numbers = #tpu.dot_dimension_numbers<[1], [0], [0], [1], [0, 0, 1, 1], [], []>} : vector<4x16xf32>, vector<16x8xf32>, vector<4x8xf32> -> vector<4x8xf32>
    %cst_25 = arith.constant dense<0.000000e+00> : vector<8x8xf32>
    %38 = tpu.matmul %23, %37, %cst_25 {dimension_numbers = #tpu.dot_dimension_numbers<[1], [0], [0], [1], [0, 0, 1, 1], [], []>} : vector<8x4xf32>, vector<4x8xf32>, vector<8x8xf32> -> vector<8x8xf32>
    %39 = arith.addf %36, %38 : vector<8x8xf32>
    %40 = vector.broadcast %24 : vector<8x1xf32> to vector<8x8xf32>
    %41 = arith.addf %39, %40 : vector<8x8xf32>
    %c0_26 = arith.constant 0 : index
    %c0_27 = arith.constant 0 : index
    %c0_28 = arith.constant 0 : index
    %c0_29 = arith.constant 0 : index
    %42 = vector.load %arg5[%c0_26, %c0_27, %c0_28, %c0_29] : memref<1x8x8x8xf32, #tpu.memory_space<vmem>>, vector<1x8x1x8xf32>
    %43 = vector.shape_cast %42 : vector<1x8x1x8xf32> to vector<8x8xf32>
    %44 = vector.shape_cast %41 : vector<8x8xf32> to vector<1x8x1x8xf32>
    tpu.vector_store %arg5[%c0_26, %c0_27, %c0_28, %c0_29], %44 {strides = array<i32>} : memref<1x8x8x8xf32, #tpu.memory_space<vmem>>, vector<1x8x1x8xf32>,
    %c0_30 = arith.constant 0 : index
    %c0_31 = arith.constant 0 : index
    %c2_32 = arith.constant 2 : index
    %c0_33 = arith.constant 0 : index
    %45 = vector.load %arg2[%c0_30, %c0_31, %c2_32, %c0_33] : memref<1x4x16x16xf32, #tpu.memory_space<vmem>>, vector<1x4x1x16xf32>
    %46 = vector.shape_cast %45 : vector<1x4x1x16xf32> to vector<4x16xf32>
    %cst_34 = arith.constant dense<0.000000e+00> : vector<4x8xf32>
    %47 = tpu.matmul %46, %8, %cst_34 {dimension_numbers = #tpu.dot_dimension_numbers<[1], [0], [0], [1], [0, 0, 1, 1], [], []>} : vector<4x16xf32>, vector<16x8xf32>, vector<4x8xf32> -> vector<4x8xf32>
    %cst_35 = arith.constant dense<0.000000e+00> : vector<8x8xf32>
    %48 = tpu.matmul %17, %47, %cst_35 {dimension_numbers = #tpu.dot_dimension_numbers<[1], [0], [0], [1], [0, 0, 1, 1], [], []>} : vector<8x4xf32>, vector<4x8xf32>, vector<8x8xf32> -> vector<8x8xf32>
    %cst_36 = arith.constant dense<0.000000e+00> : vector<4x8xf32>
    %49 = tpu.matmul %46, %15, %cst_36 {dimension_numbers = #tpu.dot_dimension_numbers<[1], [0], [0], [1], [0, 0, 1, 1], [], []>} : vector<4x16xf32>, vector<16x8xf32>, vector<4x8xf32> -> vector<4x8xf32>
    %cst_37 = arith.constant dense<0.000000e+00> : vector<8x8xf32>
    %50 = tpu.matmul %19, %49, %cst_37 {dimension_numbers = #tpu.dot_dimension_numbers<[1], [0], [0], [1], [0, 0, 1, 1], [], []>} : vector<8x4xf32>, vector<4x8xf32>, vector<8x8xf32> -> vector<8x8xf32>
    %51 = arith.addf %48, %50 : vector<8x8xf32>
    %c0_38 = arith.constant 0 : index
    %c0_39 = arith.constant 0 : index
    %c3_40 = arith.constant 3 : index
    %c0_41 = arith.constant 0 : index
    %52 = vector.load %arg2[%c0_38, %c0_39, %c3_40, %c0_41] : memref<1x4x16x16xf32, #tpu.memory_space<vmem>>, vector<1x4x1x16xf32>
    %53 = vector.shape_cast %52 : vector<1x4x1x16xf32> to vector<4x16xf32>
    %cst_42 = arith.constant dense<0.000000e+00> : vector<4x8xf32>
    %54 = tpu.matmul %53, %8, %cst_42 {dimension_numbers = #tpu.dot_dimension_numbers<[1], [0], [0], [1], [0, 0, 1, 1], [], []>} : vector<4x16xf32>, vector<16x8xf32>, vector<4x8xf32> -> vector<4x8xf32>
    %cst_43 = arith.constant dense<0.000000e+00> : vector<8x8xf32>
    %55 = tpu.matmul %21, %54, %cst_43 {dimension_numbers = #tpu.dot_dimension_numbers<[1], [0], [0], [1], [0, 0, 1, 1], [], []>} : vector<8x4xf32>, vector<4x8xf32>, vector<8x8xf32> -> vector<8x8xf32>
    %56 = arith.addf %51, %55 : vector<8x8xf32>
    %cst_44 = arith.constant dense<0.000000e+00> : vector<4x8xf32>
    %57 = tpu.matmul %53, %15, %cst_44 {dimension_numbers = #tpu.dot_dimension_numbers<[1], [0], [0], [1], [0, 0, 1, 1], [], []>} : vector<4x16xf32>, vector<16x8xf32>, vector<4x8xf32> -> vector<4x8xf32>
    %cst_45 = arith.constant dense<0.000000e+00> : vector<8x8xf32>
    %58 = tpu.matmul %23, %57, %cst_45 {dimension_numbers = #tpu.dot_dimension_numbers<[1], [0], [0], [1], [0, 0, 1, 1], [], []>} : vector<8x4xf32>, vector<4x8xf32>, vector<8x8xf32> -> vector<8x8xf32>
    %59 = arith.addf %56, %58 : vector<8x8xf32>
    %60 = vector.broadcast %24 : vector<8x1xf32> to vector<8x8xf32>
    %61 = arith.addf %59, %60 : vector<8x8xf32>
    %c0_46 = arith.constant 0 : index
    %c0_47 = arith.constant 0 : index
    %c1_48 = arith.constant 1 : index
    %c0_49 = arith.constant 0 : index
    %62 = vector.load %arg5[%c0_46, %c0_47, %c1_48, %c0_49] : memref<1x8x8x8xf32, #tpu.memory_space<vmem>>, vector<1x8x1x8xf32>
    %63 = vector.shape_cast %62 : vector<1x8x1x8xf32> to vector<8x8xf32>
    %64 = vector.shape_cast %61 : vector<8x8xf32> to vector<1x8x1x8xf32>
    tpu.vector_store %arg5[%c0_46, %c0_47, %c1_48, %c0_49], %64 {strides = array<i32>} : memref<1x8x8x8xf32, #tpu.memory_space<vmem>>, vector<1x8x1x8xf32>,
    %c0_50 = arith.constant 0 : index
    %c0_51 = arith.constant 0 : index
    %c4 = arith.constant 4 : index
    %c0_52 = arith.constant 0 : index
    %65 = vector.load %arg2[%c0_50, %c0_51, %c4, %c0_52] : memref<1x4x16x16xf32, #tpu.memory_space<vmem>>, vector<1x4x1x16xf32>
    %66 = vector.shape_cast %65 : vector<1x4x1x16xf32> to vector<4x16xf32>
    %cst_53 = arith.constant dense<0.000000e+00> : vector<4x8xf32>
    %67 = tpu.matmul %66, %8, %cst_53 {dimension_numbers = #tpu.dot_dimension_numbers<[1], [0], [0], [1], [0, 0, 1, 1], [], []>} : vector<4x16xf32>, vector<16x8xf32>, vector<4x8xf32> -> vector<4x8xf32>
    %cst_54 = arith.constant dense<0.000000e+00> : vector<8x8xf32>
    %68 = tpu.matmul %17, %67, %cst_54 {dimension_numbers = #tpu.dot_dimension_numbers<[1], [0], [0], [1], [0, 0, 1, 1], [], []>} : vector<8x4xf32>, vector<4x8xf32>, vector<8x8xf32> -> vector<8x8xf32>
    %cst_55 = arith.constant dense<0.000000e+00> : vector<4x8xf32>
    %69 = tpu.matmul %66, %15, %cst_55 {dimension_numbers = #tpu.dot_dimension_numbers<[1], [0], [0], [1], [0, 0, 1, 1], [], []>} : vector<4x16xf32>, vector<16x8xf32>, vector<4x8xf32> -> vector<4x8xf32>
    %cst_56 = arith.constant dense<0.000000e+00> : vector<8x8xf32>
    %70 = tpu.matmul %19, %69, %cst_56 {dimension_numbers = #tpu.dot_dimension_numbers<[1], [0], [0], [1], [0, 0, 1, 1], [], []>} : vector<8x4xf32>, vector<4x8xf32>, vector<8x8xf32> -> vector<8x8xf32>
    %71 = arith.addf %68, %70 : vector<8x8xf32>
    %c0_57 = arith.constant 0 : index
    %c0_58 = arith.constant 0 : index
    %c5 = arith.constant 5 : index
    %c0_59 = arith.constant 0 : index
    %72 = vector.load %arg2[%c0_57, %c0_58, %c5, %c0_59] : memref<1x4x16x16xf32, #tpu.memory_space<vmem>>, vector<1x4x1x16xf32>
    %73 = vector.shape_cast %72 : vector<1x4x1x16xf32> to vector<4x16xf32>
    %cst_60 = arith.constant dense<0.000000e+00> : vector<4x8xf32>
    %74 = tpu.matmul %73, %8, %cst_60 {dimension_numbers = #tpu.dot_dimension_numbers<[1], [0], [0], [1], [0, 0, 1, 1], [], []>} : vector<4x16xf32>, vector<16x8xf32>, vector<4x8xf32> -> vector<4x8xf32>
    %cst_61 = arith.constant dense<0.000000e+00> : vector<8x8xf32>
    %75 = tpu.matmul %21, %74, %cst_61 {dimension_numbers = #tpu.dot_dimension_numbers<[1], [0], [0], [1], [0, 0, 1, 1], [], []>} : vector<8x4xf32>, vector<4x8xf32>, vector<8x8xf32> -> vector<8x8xf32>
    %76 = arith.addf %71, %75 : vector<8x8xf32>
    %cst_62 = arith.constant dense<0.000000e+00> : vector<4x8xf32>
    %77 = tpu.matmul %73, %15, %cst_62 {dimension_numbers = #tpu.dot_dimension_numbers<[1], [0], [0], [1], [0, 0, 1, 1], [], []>} : vector<4x16xf32>, vector<16x8xf32>, vector<4x8xf32> -> vector<4x8xf32>
    %cst_63 = arith.constant dense<0.000000e+00> : vector<8x8xf32>
    %78 = tpu.matmul %23, %77, %cst_63 {dimension_numbers = #tpu.dot_dimension_numbers<[1], [0], [0], [1], [0, 0, 1, 1], [], []>} : vector<8x4xf32>, vector<4x8xf32>, vector<8x8xf32> -> vector<8x8xf32>
    %79 = arith.addf %76, %78 : vector<8x8xf32>
    %80 = vector.broadcast %24 : vector<8x1xf32> to vector<8x8xf32>
    %81 = arith.addf %79, %80 : vector<8x8xf32>
    %c0_64 = arith.constant 0 : index
    %c0_65 = arith.constant 0 : index
    %c2_66 = arith.constant 2 : index
    %c0_67 = arith.constant 0 : index
    %82 = vector.load %arg5[%c0_64, %c0_65, %c2_66, %c0_67] : memref<1x8x8x8xf32, #tpu.memory_space<vmem>>, vector<1x8x1x8xf32>
    %83 = vector.shape_cast %82 : vector<1x8x1x8xf32> to vector<8x8xf32>
    %84 = vector.shape_cast %81 : vector<8x8xf32> to vector<1x8x1x8xf32>
    tpu.vector_store %arg5[%c0_64, %c0_65, %c2_66, %c0_67], %84 {strides = array<i32>} : memref<1x8x8x8xf32, #tpu.memory_space<vmem>>, vector<1x8x1x8xf32>,
    %c0_68 = arith.constant 0 : index
    %c0_69 = arith.constant 0 : index
    %c6 = arith.constant 6 : index
    %c0_70 = arith.constant 0 : index
    %85 = vector.load %arg2[%c0_68, %c0_69, %c6, %c0_70] : memref<1x4x16x16xf32, #tpu.memory_space<vmem>>, vector<1x4x1x16xf32>
    %86 = vector.shape_cast %85 : vector<1x4x1x16xf32> to vector<4x16xf32>
    %cst_71 = arith.constant dense<0.000000e+00> : vector<4x8xf32>
    %87 = tpu.matmul %86, %8, %cst_71 {dimension_numbers = #tpu.dot_dimension_numbers<[1], [0], [0], [1], [0, 0, 1, 1], [], []>} : vector<4x16xf32>, vector<16x8xf32>, vector<4x8xf32> -> vector<4x8xf32>
    %cst_72 = arith.constant dense<0.000000e+00> : vector<8x8xf32>
    %88 = tpu.matmul %17, %87, %cst_72 {dimension_numbers = #tpu.dot_dimension_numbers<[1], [0], [0], [1], [0, 0, 1, 1], [], []>} : vector<8x4xf32>, vector<4x8xf32>, vector<8x8xf32> -> vector<8x8xf32>
    %cst_73 = arith.constant dense<0.000000e+00> : vector<4x8xf32>
    %89 = tpu.matmul %86, %15, %cst_73 {dimension_numbers = #tpu.dot_dimension_numbers<[1], [0], [0], [1], [0, 0, 1, 1], [], []>} : vector<4x16xf32>, vector<16x8xf32>, vector<4x8xf32> -> vector<4x8xf32>
    %cst_74 = arith.constant dense<0.000000e+00> : vector<8x8xf32>
    %90 = tpu.matmul %19, %89, %cst_74 {dimension_numbers = #tpu.dot_dimension_numbers<[1], [0], [0], [1], [0, 0, 1, 1], [], []>} : vector<8x4xf32>, vector<4x8xf32>, vector<8x8xf32> -> vector<8x8xf32>
    %91 = arith.addf %88, %90 : vector<8x8xf32>
    %c0_75 = arith.constant 0 : index
    %c0_76 = arith.constant 0 : index
    %c7 = arith.constant 7 : index
    %c0_77 = arith.constant 0 : index
    %92 = vector.load %arg2[%c0_75, %c0_76, %c7, %c0_77] : memref<1x4x16x16xf32, #tpu.memory_space<vmem>>, vector<1x4x1x16xf32>
    %93 = vector.shape_cast %92 : vector<1x4x1x16xf32> to vector<4x16xf32>
    %cst_78 = arith.constant dense<0.000000e+00> : vector<4x8xf32>
    %94 = tpu.matmul %93, %8, %cst_78 {dimension_numbers = #tpu.dot_dimension_numbers<[1], [0], [0], [1], [0, 0, 1, 1], [], []>} : vector<4x16xf32>, vector<16x8xf32>, vector<4x8xf32> -> vector<4x8xf32>
    %cst_79 = arith.constant dense<0.000000e+00> : vector<8x8xf32>
    %95 = tpu.matmul %21, %94, %cst_79 {dimension_numbers = #tpu.dot_dimension_numbers<[1], [0], [0], [1], [0, 0, 1, 1], [], []>} : vector<8x4xf32>, vector<4x8xf32>, vector<8x8xf32> -> vector<8x8xf32>
    %96 = arith.addf %91, %95 : vector<8x8xf32>
    %cst_80 = arith.constant dense<0.000000e+00> : vector<4x8xf32>
    %97 = tpu.matmul %93, %15, %cst_80 {dimension_numbers = #tpu.dot_dimension_numbers<[1], [0], [0], [1], [0, 0, 1, 1], [], []>} : vector<4x16xf32>, vector<16x8xf32>, vector<4x8xf32> -> vector<4x8xf32>
    %cst_81 = arith.constant dense<0.000000e+00> : vector<8x8xf32>
    %98 = tpu.matmul %23, %97, %cst_81 {dimension_numbers = #tpu.dot_dimension_numbers<[1], [0], [0], [1], [0, 0, 1, 1], [], []>} : vector<8x4xf32>, vector<4x8xf32>, vector<8x8xf32> -> vector<8x8xf32>
    %99 = arith.addf %96, %98 : vector<8x8xf32>
    %100 = vector.broadcast %24 : vector<8x1xf32> to vector<8x8xf32>
    %101 = arith.addf %99, %100 : vector<8x8xf32>
    %c0_82 = arith.constant 0 : index
    %c0_83 = arith.constant 0 : index
    %c3_84 = arith.constant 3 : index
    %c0_85 = arith.constant 0 : index
    %102 = vector.load %arg5[%c0_82, %c0_83, %c3_84, %c0_85] : memref<1x8x8x8xf32, #tpu.memory_space<vmem>>, vector<1x8x1x8xf32>
    %103 = vector.shape_cast %102 : vector<1x8x1x8xf32> to vector<8x8xf32>
    %104 = vector.shape_cast %101 : vector<8x8xf32> to vector<1x8x1x8xf32>
    tpu.vector_store %arg5[%c0_82, %c0_83, %c3_84, %c0_85], %104 {strides = array<i32>} : memref<1x8x8x8xf32, #tpu.memory_space<vmem>>, vector<1x8x1x8xf32>,
    %c0_86 = arith.constant 0 : index
    %c0_87 = arith.constant 0 : index
    %c8 = arith.constant 8 : index
    %c0_88 = arith.constant 0 : index
    %105 = vector.load %arg2[%c0_86, %c0_87, %c8, %c0_88] : memref<1x4x16x16xf32, #tpu.memory_space<vmem>>, vector<1x4x1x16xf32>
    %106 = vector.shape_cast %105 : vector<1x4x1x16xf32> to vector<4x16xf32>
    %cst_89 = arith.constant dense<0.000000e+00> : vector<4x8xf32>
    %107 = tpu.matmul %106, %8, %cst_89 {dimension_numbers = #tpu.dot_dimension_numbers<[1], [0], [0], [1], [0, 0, 1, 1], [], []>} : vector<4x16xf32>, vector<16x8xf32>, vector<4x8xf32> -> vector<4x8xf32>
    %cst_90 = arith.constant dense<0.000000e+00> : vector<8x8xf32>
    %108 = tpu.matmul %17, %107, %cst_90 {dimension_numbers = #tpu.dot_dimension_numbers<[1], [0], [0], [1], [0, 0, 1, 1], [], []>} : vector<8x4xf32>, vector<4x8xf32>, vector<8x8xf32> -> vector<8x8xf32>
    %cst_91 = arith.constant dense<0.000000e+00> : vector<4x8xf32>
    %109 = tpu.matmul %106, %15, %cst_91 {dimension_numbers = #tpu.dot_dimension_numbers<[1], [0], [0], [1], [0, 0, 1, 1], [], []>} : vector<4x16xf32>, vector<16x8xf32>, vector<4x8xf32> -> vector<4x8xf32>
    %cst_92 = arith.constant dense<0.000000e+00> : vector<8x8xf32>
    %110 = tpu.matmul %19, %109, %cst_92 {dimension_numbers = #tpu.dot_dimension_numbers<[1], [0], [0], [1], [0, 0, 1, 1], [], []>} : vector<8x4xf32>, vector<4x8xf32>, vector<8x8xf32> -> vector<8x8xf32>
    %111 = arith.addf %108, %110 : vector<8x8xf32>
    %c0_93 = arith.constant 0 : index
    %c0_94 = arith.constant 0 : index
    %c9 = arith.constant 9 : index
    %c0_95 = arith.constant 0 : index
    %112 = vector.load %arg2[%c0_93, %c0_94, %c9, %c0_95] : memref<1x4x16x16xf32, #tpu.memory_space<vmem>>, vector<1x4x1x16xf32>
    %113 = vector.shape_cast %112 : vector<1x4x1x16xf32> to vector<4x16xf32>
    %cst_96 = arith.constant dense<0.000000e+00> : vector<4x8xf32>
    %114 = tpu.matmul %113, %8, %cst_96 {dimension_numbers = #tpu.dot_dimension_numbers<[1], [0], [0], [1], [0, 0, 1, 1], [], []>} : vector<4x16xf32>, vector<16x8xf32>, vector<4x8xf32> -> vector<4x8xf32>
    %cst_97 = arith.constant dense<0.000000e+00> : vector<8x8xf32>
    %115 = tpu.matmul %21, %114, %cst_97 {dimension_numbers = #tpu.dot_dimension_numbers<[1], [0], [0], [1], [0, 0, 1, 1], [], []>} : vector<8x4xf32>, vector<4x8xf32>, vector<8x8xf32> -> vector<8x8xf32>
    %116 = arith.addf %111, %115 : vector<8x8xf32>
    %cst_98 = arith.constant dense<0.000000e+00> : vector<4x8xf32>
    %117 = tpu.matmul %113, %15, %cst_98 {dimension_numbers = #tpu.dot_dimension_numbers<[1], [0], [0], [1], [0, 0, 1, 1], [], []>} : vector<4x16xf32>, vector<16x8xf32>, vector<4x8xf32> -> vector<4x8xf32>
    %cst_99 = arith.constant dense<0.000000e+00> : vector<8x8xf32>
    %118 = tpu.matmul %23, %117, %cst_99 {dimension_numbers = #tpu.dot_dimension_numbers<[1], [0], [0], [1], [0, 0, 1, 1], [], []>} : vector<8x4xf32>, vector<4x8xf32>, vector<8x8xf32> -> vector<8x8xf32>
    %119 = arith.addf %116, %118 : vector<8x8xf32>
    %120 = vector.broadcast %24 : vector<8x1xf32> to vector<8x8xf32>
    %121 = arith.addf %119, %120 : vector<8x8xf32>
    %c0_100 = arith.constant 0 : index
    %c0_101 = arith.constant 0 : index
    %c4_102 = arith.constant 4 : index
    %c0_103 = arith.constant 0 : index
    %122 = vector.load %arg5[%c0_100, %c0_101, %c4_102, %c0_103] : memref<1x8x8x8xf32, #tpu.memory_space<vmem>>, vector<1x8x1x8xf32>
    %123 = vector.shape_cast %122 : vector<1x8x1x8xf32> to vector<8x8xf32>
    %124 = vector.shape_cast %121 : vector<8x8xf32> to vector<1x8x1x8xf32>
    tpu.vector_store %arg5[%c0_100, %c0_101, %c4_102, %c0_103], %124 {strides = array<i32>} : memref<1x8x8x8xf32, #tpu.memory_space<vmem>>, vector<1x8x1x8xf32>,
    %c0_104 = arith.constant 0 : index
    %c0_105 = arith.constant 0 : index
    %c10 = arith.constant 10 : index
    %c0_106 = arith.constant 0 : index
    %125 = vector.load %arg2[%c0_104, %c0_105, %c10, %c0_106] : memref<1x4x16x16xf32, #tpu.memory_space<vmem>>, vector<1x4x1x16xf32>
    %126 = vector.shape_cast %125 : vector<1x4x1x16xf32> to vector<4x16xf32>
    %cst_107 = arith.constant dense<0.000000e+00> : vector<4x8xf32>
    %127 = tpu.matmul %126, %8, %cst_107 {dimension_numbers = #tpu.dot_dimension_numbers<[1], [0], [0], [1], [0, 0, 1, 1], [], []>} : vector<4x16xf32>, vector<16x8xf32>, vector<4x8xf32> -> vector<4x8xf32>
    %cst_108 = arith.constant dense<0.000000e+00> : vector<8x8xf32>
    %128 = tpu.matmul %17, %127, %cst_108 {dimension_numbers = #tpu.dot_dimension_numbers<[1], [0], [0], [1], [0, 0, 1, 1], [], []>} : vector<8x4xf32>, vector<4x8xf32>, vector<8x8xf32> -> vector<8x8xf32>
    %cst_109 = arith.constant dense<0.000000e+00> : vector<4x8xf32>
    %129 = tpu.matmul %126, %15, %cst_109 {dimension_numbers = #tpu.dot_dimension_numbers<[1], [0], [0], [1], [0, 0, 1, 1], [], []>} : vector<4x16xf32>, vector<16x8xf32>, vector<4x8xf32> -> vector<4x8xf32>
    %cst_110 = arith.constant dense<0.000000e+00> : vector<8x8xf32>
    %130 = tpu.matmul %19, %129, %cst_110 {dimension_numbers = #tpu.dot_dimension_numbers<[1], [0], [0], [1], [0, 0, 1, 1], [], []>} : vector<8x4xf32>, vector<4x8xf32>, vector<8x8xf32> -> vector<8x8xf32>
    %131 = arith.addf %128, %130 : vector<8x8xf32>
    %c0_111 = arith.constant 0 : index
    %c0_112 = arith.constant 0 : index
    %c11 = arith.constant 11 : index
    %c0_113 = arith.constant 0 : index
    %132 = vector.load %arg2[%c0_111, %c0_112, %c11, %c0_113] : memref<1x4x16x16xf32, #tpu.memory_space<vmem>>, vector<1x4x1x16xf32>
    %133 = vector.shape_cast %132 : vector<1x4x1x16xf32> to vector<4x16xf32>
    %cst_114 = arith.constant dense<0.000000e+00> : vector<4x8xf32>
    %134 = tpu.matmul %133, %8, %cst_114 {dimension_numbers = #tpu.dot_dimension_numbers<[1], [0], [0], [1], [0, 0, 1, 1], [], []>} : vector<4x16xf32>, vector<16x8xf32>, vector<4x8xf32> -> vector<4x8xf32>
    %cst_115 = arith.constant dense<0.000000e+00> : vector<8x8xf32>
    %135 = tpu.matmul %21, %134, %cst_115 {dimension_numbers = #tpu.dot_dimension_numbers<[1], [0], [0], [1], [0, 0, 1, 1], [], []>} : vector<8x4xf32>, vector<4x8xf32>, vector<8x8xf32> -> vector<8x8xf32>
    %136 = arith.addf %131, %135 : vector<8x8xf32>
    %cst_116 = arith.constant dense<0.000000e+00> : vector<4x8xf32>
    %137 = tpu.matmul %133, %15, %cst_116 {dimension_numbers = #tpu.dot_dimension_numbers<[1], [0], [0], [1], [0, 0, 1, 1], [], []>} : vector<4x16xf32>, vector<16x8xf32>, vector<4x8xf32> -> vector<4x8xf32>
    %cst_117 = arith.constant dense<0.000000e+00> : vector<8x8xf32>
    %138 = tpu.matmul %23, %137, %cst_117 {dimension_numbers = #tpu.dot_dimension_numbers<[1], [0], [0], [1], [0, 0, 1, 1], [], []>} : vector<8x4xf32>, vector<4x8xf32>, vector<8x8xf32> -> vector<8x8xf32>
    %139 = arith.addf %136, %138 : vector<8x8xf32>
    %140 = vector.broadcast %24 : vector<8x1xf32> to vector<8x8xf32>
    %141 = arith.addf %139, %140 : vector<8x8xf32>
    %c0_118 = arith.constant 0 : index
    %c0_119 = arith.constant 0 : index
    %c5_120 = arith.constant 5 : index
    %c0_121 = arith.constant 0 : index
    %142 = vector.load %arg5[%c0_118, %c0_119, %c5_120, %c0_121] : memref<1x8x8x8xf32, #tpu.memory_space<vmem>>, vector<1x8x1x8xf32>
    %143 = vector.shape_cast %142 : vector<1x8x1x8xf32> to vector<8x8xf32>
    %144 = vector.shape_cast %141 : vector<8x8xf32> to vector<1x8x1x8xf32>
    tpu.vector_store %arg5[%c0_118, %c0_119, %c5_120, %c0_121], %144 {strides = array<i32>} : memref<1x8x8x8xf32, #tpu.memory_space<vmem>>, vector<1x8x1x8xf32>,
    %c0_122 = arith.constant 0 : index
    %c0_123 = arith.constant 0 : index
    %c12 = arith.constant 12 : index
    %c0_124 = arith.constant 0 : index
    %145 = vector.load %arg2[%c0_122, %c0_123, %c12, %c0_124] : memref<1x4x16x16xf32, #tpu.memory_space<vmem>>, vector<1x4x1x16xf32>
    %146 = vector.shape_cast %145 : vector<1x4x1x16xf32> to vector<4x16xf32>
    %cst_125 = arith.constant dense<0.000000e+00> : vector<4x8xf32>
    %147 = tpu.matmul %146, %8, %cst_125 {dimension_numbers = #tpu.dot_dimension_numbers<[1], [0], [0], [1], [0, 0, 1, 1], [], []>} : vector<4x16xf32>, vector<16x8xf32>, vector<4x8xf32> -> vector<4x8xf32>
    %cst_126 = arith.constant dense<0.000000e+00> : vector<8x8xf32>
    %148 = tpu.matmul %17, %147, %cst_126 {dimension_numbers = #tpu.dot_dimension_numbers<[1], [0], [0], [1], [0, 0, 1, 1], [], []>} : vector<8x4xf32>, vector<4x8xf32>, vector<8x8xf32> -> vector<8x8xf32>
    %cst_127 = arith.constant dense<0.000000e+00> : vector<4x8xf32>
    %149 = tpu.matmul %146, %15, %cst_127 {dimension_numbers = #tpu.dot_dimension_numbers<[1], [0], [0], [1], [0, 0, 1, 1], [], []>} : vector<4x16xf32>, vector<16x8xf32>, vector<4x8xf32> -> vector<4x8xf32>
    %cst_128 = arith.constant dense<0.000000e+00> : vector<8x8xf32>
    %150 = tpu.matmul %19, %149, %cst_128 {dimension_numbers = #tpu.dot_dimension_numbers<[1], [0], [0], [1], [0, 0, 1, 1], [], []>} : vector<8x4xf32>, vector<4x8xf32>, vector<8x8xf32> -> vector<8x8xf32>
    %151 = arith.addf %148, %150 : vector<8x8xf32>
    %c0_129 = arith.constant 0 : index
    %c0_130 = arith.constant 0 : index
    %c13 = arith.constant 13 : index
    %c0_131 = arith.constant 0 : index
    %152 = vector.load %arg2[%c0_129, %c0_130, %c13, %c0_131] : memref<1x4x16x16xf32, #tpu.memory_space<vmem>>, vector<1x4x1x16xf32>
    %153 = vector.shape_cast %152 : vector<1x4x1x16xf32> to vector<4x16xf32>
    %cst_132 = arith.constant dense<0.000000e+00> : vector<4x8xf32>
    %154 = tpu.matmul %153, %8, %cst_132 {dimension_numbers = #tpu.dot_dimension_numbers<[1], [0], [0], [1], [0, 0, 1, 1], [], []>} : vector<4x16xf32>, vector<16x8xf32>, vector<4x8xf32> -> vector<4x8xf32>
    %cst_133 = arith.constant dense<0.000000e+00> : vector<8x8xf32>
    %155 = tpu.matmul %21, %154, %cst_133 {dimension_numbers = #tpu.dot_dimension_numbers<[1], [0], [0], [1], [0, 0, 1, 1], [], []>} : vector<8x4xf32>, vector<4x8xf32>, vector<8x8xf32> -> vector<8x8xf32>
    %156 = arith.addf %151, %155 : vector<8x8xf32>
    %cst_134 = arith.constant dense<0.000000e+00> : vector<4x8xf32>
    %157 = tpu.matmul %153, %15, %cst_134 {dimension_numbers = #tpu.dot_dimension_numbers<[1], [0], [0], [1], [0, 0, 1, 1], [], []>} : vector<4x16xf32>, vector<16x8xf32>, vector<4x8xf32> -> vector<4x8xf32>
    %cst_135 = arith.constant dense<0.000000e+00> : vector<8x8xf32>
    %158 = tpu.matmul %23, %157, %cst_135 {dimension_numbers = #tpu.dot_dimension_numbers<[1], [0], [0], [1], [0, 0, 1, 1], [], []>} : vector<8x4xf32>, vector<4x8xf32>, vector<8x8xf32> -> vector<8x8xf32>
    %159 = arith.addf %156, %158 : vector<8x8xf32>
    %160 = vector.broadcast %24 : vector<8x1xf32> to vector<8x8xf32>
    %161 = arith.addf %159, %160 : vector<8x8xf32>
    %c0_136 = arith.constant 0 : index
    %c0_137 = arith.constant 0 : index
    %c6_138 = arith.constant 6 : index
    %c0_139 = arith.constant 0 : index
    %162 = vector.load %arg5[%c0_136, %c0_137, %c6_138, %c0_139] : memref<1x8x8x8xf32, #tpu.memory_space<vmem>>, vector<1x8x1x8xf32>
    %163 = vector.shape_cast %162 : vector<1x8x1x8xf32> to vector<8x8xf32>
    %164 = vector.shape_cast %161 : vector<8x8xf32> to vector<1x8x1x8xf32>
    tpu.vector_store %arg5[%c0_136, %c0_137, %c6_138, %c0_139], %164 {strides = array<i32>} : memref<1x8x8x8xf32, #tpu.memory_space<vmem>>, vector<1x8x1x8xf32>,
    %c0_140 = arith.constant 0 : index
    %c0_141 = arith.constant 0 : index
    %c14 = arith.constant 14 : index
    %c0_142 = arith.constant 0 : index
    %165 = vector.load %arg2[%c0_140, %c0_141, %c14, %c0_142] : memref<1x4x16x16xf32, #tpu.memory_space<vmem>>, vector<1x4x1x16xf32>
    %166 = vector.shape_cast %165 : vector<1x4x1x16xf32> to vector<4x16xf32>
    %cst_143 = arith.constant dense<0.000000e+00> : vector<4x8xf32>
    %167 = tpu.matmul %166, %8, %cst_143 {dimension_numbers = #tpu.dot_dimension_numbers<[1], [0], [0], [1], [0, 0, 1, 1], [], []>} : vector<4x16xf32>, vector<16x8xf32>, vector<4x8xf32> -> vector<4x8xf32>
    %cst_144 = arith.constant dense<0.000000e+00> : vector<8x8xf32>
    %168 = tpu.matmul %17, %167, %cst_144 {dimension_numbers = #tpu.dot_dimension_numbers<[1], [0], [0], [1], [0, 0, 1, 1], [], []>} : vector<8x4xf32>, vector<4x8xf32>, vector<8x8xf32> -> vector<8x8xf32>
    %cst_145 = arith.constant dense<0.000000e+00> : vector<4x8xf32>
    %169 = tpu.matmul %166, %15, %cst_145 {dimension_numbers = #tpu.dot_dimension_numbers<[1], [0], [0], [1], [0, 0, 1, 1], [], []>} : vector<4x16xf32>, vector<16x8xf32>, vector<4x8xf32> -> vector<4x8xf32>
    %cst_146 = arith.constant dense<0.000000e+00> : vector<8x8xf32>
    %170 = tpu.matmul %19, %169, %cst_146 {dimension_numbers = #tpu.dot_dimension_numbers<[1], [0], [0], [1], [0, 0, 1, 1], [], []>} : vector<8x4xf32>, vector<4x8xf32>, vector<8x8xf32> -> vector<8x8xf32>
    %171 = arith.addf %168, %170 : vector<8x8xf32>
    %c0_147 = arith.constant 0 : index
    %c0_148 = arith.constant 0 : index
    %c15 = arith.constant 15 : index
    %c0_149 = arith.constant 0 : index
    %172 = vector.load %arg2[%c0_147, %c0_148, %c15, %c0_149] : memref<1x4x16x16xf32, #tpu.memory_space<vmem>>, vector<1x4x1x16xf32>
    %173 = vector.shape_cast %172 : vector<1x4x1x16xf32> to vector<4x16xf32>
    %cst_150 = arith.constant dense<0.000000e+00> : vector<4x8xf32>
    %174 = tpu.matmul %173, %8, %cst_150 {dimension_numbers = #tpu.dot_dimension_numbers<[1], [0], [0], [1], [0, 0, 1, 1], [], []>} : vector<4x16xf32>, vector<16x8xf32>, vector<4x8xf32> -> vector<4x8xf32>
    %cst_151 = arith.constant dense<0.000000e+00> : vector<8x8xf32>
    %175 = tpu.matmul %21, %174, %cst_151 {dimension_numbers = #tpu.dot_dimension_numbers<[1], [0], [0], [1], [0, 0, 1, 1], [], []>} : vector<8x4xf32>, vector<4x8xf32>, vector<8x8xf32> -> vector<8x8xf32>
    %176 = arith.addf %171, %175 : vector<8x8xf32>
    %cst_152 = arith.constant dense<0.000000e+00> : vector<4x8xf32>
    %177 = tpu.matmul %173, %15, %cst_152 {dimension_numbers = #tpu.dot_dimension_numbers<[1], [0], [0], [1], [0, 0, 1, 1], [], []>} : vector<4x16xf32>, vector<16x8xf32>, vector<4x8xf32> -> vector<4x8xf32>
    %cst_153 = arith.constant dense<0.000000e+00> : vector<8x8xf32>
    %178 = tpu.matmul %23, %177, %cst_153 {dimension_numbers = #tpu.dot_dimension_numbers<[1], [0], [0], [1], [0, 0, 1, 1], [], []>} : vector<8x4xf32>, vector<4x8xf32>, vector<8x8xf32> -> vector<8x8xf32>
    %179 = arith.addf %176, %178 : vector<8x8xf32>
    %180 = vector.broadcast %24 : vector<8x1xf32> to vector<8x8xf32>
    %181 = arith.addf %179, %180 : vector<8x8xf32>
    %c0_154 = arith.constant 0 : index
    %c0_155 = arith.constant 0 : index
    %c7_156 = arith.constant 7 : index
    %c0_157 = arith.constant 0 : index
    %182 = vector.load %arg5[%c0_154, %c0_155, %c7_156, %c0_157] : memref<1x8x8x8xf32, #tpu.memory_space<vmem>>, vector<1x8x1x8xf32>
    %183 = vector.shape_cast %182 : vector<1x8x1x8xf32> to vector<8x8xf32>
    %184 = vector.shape_cast %181 : vector<8x8xf32> to vector<1x8x1x8xf32>
    tpu.vector_store %arg5[%c0_154, %c0_155, %c7_156, %c0_157], %184 {strides = array<i32>} : memref<1x8x8x8xf32, #tpu.memory_space<vmem>>, vector<1x8x1x8xf32>,
    return
  }
  func.func @transform_0(%arg0: i32, %arg1: i32) -> (i32, i32, i32, i32) {
    %c0_i32 = arith.constant 0 : i32
    %c0_i32_0 = arith.constant 0 : i32
    %c0_i32_1 = arith.constant 0 : i32
    return %arg0, %c0_i32, %arg1, %c0_i32_0 : i32, i32, i32, i32
  }
  func.func @transform_1(%arg0: i32, %arg1: i32) -> (i32, i32, i32) {
    %c0_i32 = arith.constant 0 : i32
    %c0_i32_0 = arith.constant 0 : i32
    %c0_i32_1 = arith.constant 0 : i32
    %c0_i32_2 = arith.constant 0 : i32
    return %c0_i32, %c0_i32_0, %c0_i32_1 : i32, i32, i32
  }
  func.func @transform_2(%arg0: i32, %arg1: i32) -> (i32, i32) {
    %c0_i32 = arith.constant 0 : i32
    %c0_i32_0 = arith.constant 0 : i32
    %c0_i32_1 = arith.constant 0 : i32
    return %c0_i32, %c0_i32_0 : i32, i32
  }
  func.func @transform_3(%arg0: i32, %arg1: i32) -> (i32, i32, i32, i32) {
    %c0_i32 = arith.constant 0 : i32
    %c0_i32_0 = arith.constant 0 : i32
    %c0_i32_1 = arith.constant 0 : i32
    return %arg0, %c0_i32, %arg1, %c0_i32_0 : i32, i32, i32, i32
  }
}

</mosaic_0001>

<bundles_post_ra>
// kernel: tpu_custom_call.1
= control target key start
LH: loop header
LB: loop body
LE: loop exit
PB: predicated region body
PF: predicated region fallthrough
CT: control target
= control target key end

     0   :  { %8 = vsyncpa [#allocation3], 0  ;;  %s7753_s0 = inlined_call_operand.hbm [shape: f32[2,4,16,16], index: 0, kind: input, shape index: {}]   ;;  %s7754_s1 = inlined_call_operand.vmem [shape: f32[4,8,4], index: 1, kind: input, shape index: {}]   ;;  %s7755_s2 = inlined_call_operand.vmem [shape: f32[8,1], index: 2, kind: input, shape index: {}]   ;;  %s7756_s3 = inlined_call_operand.hbm [shape: f32[2,8,8,8], index: 3, kind: output, shape index: {}]  }
   0x1   :  { %10 = vsyncpa [#allocation3 + $0x1], 0 }
   0x2   :  { %11 = vsyncpa [#allocation4], 0 }
   0x3   :  { %13 = vsyncpa [#allocation4 + $0x1], 0  ;;  %s6689_s12 = smov 0   ;;  %s6691_s13 = smov 0  }
   0x4   :  { %s6693_s14 = smov 0   ;;  %s6695_s15 = smov 0  }
   0x5   :  { %s6697_s16 = smov 0   ;;  %s6699_s17 = smov 0  }
   0x6 LB: > { %s5744_s18 = sadd.s32 4294967295, %s6656_s17   ;;  %s5745_s19 = sadd.s32 4294967294, %s6656_s17   ;;  %s6656_s17 = sphi %s6699_s17, %s19_s17   ;;  %s6652_s16 = sphi %s6697_s16, %s7775_s16   ;;  %s6648_s15 = sphi %s6695_s15, %s7774_s15   ;;  %s6644_s14 = sphi %s6693_s14, %s7773_s14   ;;  %s6640_s13 = sphi %s6691_s13, %s7772_s13   ;;  %s6636_s12 = sphi %s6689_s12, %s7771_s12  }
   0x7   : > { %s31_s20 = sadd.s32 1, %s6652_s16  ;;  %s40_s21 = sadd.s32 1, %s6644_s14 }
   0x8   : > { %p33_p0 = scmp.ge.s32.totalorder %s31_s20, 2  ;;  %p47_p1 = scmp.ne.s32.totalorder %s6644_s14, %s6640_s13 }
   0x9   : > { %p48_p2 = scmp.eq.s32.totalorder %s6656_s17, 0  ;;  %p53_p3 = scmp.ne.s32.totalorder %s6640_s13, %s6636_s12 }
   0xa   : > { %s7777_s20 = smov (%p33_p0, %s31_s20), 0  ;;  %p54_p5 = scmp.eq.s32.totalorder %s5744_s18, 0 }
   0xb   : > { %p6730_p4 = por %p48_p2, %p47_p1  ;;  %s35_s23 = ssub.s32 %s6652_s16, %s7777_s20 }
   0xc   : > { %p121_p6 = scmp.eq.s32.totalorder %s5744_s18, 1  ;;  %p38_p7 = scmp.eq.s32.totalorder %s35_s23, 0 }
   0xd   : > { %p6736_p8 = por %p54_p5, %p53_p3  ;;  %p127_p10 = scmp.eq.s32.totalorder %s5745_s19, 1 }
   0xe   : > { %p6740_p9 = por %p121_p6, %p47_p1  ;;  %p6484_p13 = scmp.lt.s32.totalorder %s6656_s17, 2 }
   0xf   : > { %s6745_s26 = scalar_select %p38_p7, %s6644_s14, %s40_s21  }
  0x10   : > { %p6747_p11 = por %p127_p10, %p53_p3  ;;  %s153_s28 = sand.u32 1, %s6644_s14  }
  0x11   : > { %s5748_s29 = sshll.u32 %s153_s28, 6  ;;  %s5926_s30 = sshll.u32 %s6652_s16, 10 }
  0x12   : > { %s165_s6 = scalar_lea.hbm %s7753_s0, %s5926_s30  ;;  %s157_s7 = scalar_lea.vmem [#allocation2], %s5748_s29 }
  0x13   : > { %s166_s8 = sshll.u32 %s157_s7, 4  ;;  %p6760_p0 = pnand %p6484_p13, %p6730_p4  ;;  %s167_s8 = int_to_ptr.vmem [resolvable:$true] %s166_s8 }
  0x14   : > { %p5751_p1 = scmp.ge.s32.totalorder %s6656_s17, 1  ;;  %s154_s10 = scalar_lea.sflag [#allocation3], %s153_s28 }
  0x15   : > { %p6550_p2 = pneg %p6760_p0  ;;  %s6561_s11 = scalar_lea.vmem %s167_s8, 1024 }
  0x16   : > { %p6562_p3 = scmp.ne.s32.totalorder %s167_s8, %s6561_s11  ;;  %s6658_s18 = smov [#allocation2]  }
  0x17   : > { %s6566_s19 = sshll.u32 %s6658_s18, 4  ;;  %s6567_s19 = int_to_ptr.vmem [resolvable:$false] %s6566_s19 }
  0x18   : > { %p6564_p5 = pnand %p6562_p3, %p6550_p2  ;;  %s6568_s21 = scalar_lea.vmem %s6567_s19, 2048 }
  0x19   : > { %p6569_p7 = scmp.lt.s32.totalorder %s167_s8, %s6567_s19  ;;  %p6570_p10 = scmp.lt.s32.totalorder %s6568_s21, %s6561_s11 }
  0x1a   : > { %p6565_p6 = pneg %p6564_p5 }
  0x1b   : > { %p6571_p12 = por %p6570_p10, %p6569_p7 }
  0x1d   : > { %p6572_p4 = pnand %p6571_p12, %p6565_p6 }
  0x1f   : > { %6575 = shalt.err (!%p6572_p4)
}
  0x20   : > { %s6659_s22 = smov 128   ;;  %s6660_s23 = smov 8  }
  0x21   : > { %6479 = dma.hbm_to_vmem [thread:$0]  (!%p6760_p0), %s165_s6, 1024, %s167_s8, %s154_s10, %s6659_s22, %s6659_s22, %s6660_s23  }
  0x22   : > { %p174_p13 = scmp.lt.s32.totalorder %s6656_s17, 3 }
  0x24   : > { %p175_p2 = pnand %p5751_p1, %p174_p13 }
  0x25   : > { %s6773_s28 = sand.u32 (!%p175_p2), 1, %s6640_s13  }
  0x26   : > { %178 = sbr.rel (%p175_p2) target bundleno = 3480 (0xd98), region = 32  ;;  %s5752_s29 = sshll.u32 (!%p175_p2), %s6773_s28, 6 }
  0x27   : > { %s181_s30 = scalar_lea.sflag (!%p175_p2), [#allocation3], %s6773_s28  ;;  %s6779_s4 = scalar_lea.vmem (!%p175_p2), [#allocation2], %s5752_s29 }
  0x2b   : > { %6627 = dma.done.wait (%p6736_p8), %s181_s30, 1024  }
  0x2c   : > { %6629 = vsyncadd (%p6736_p8), %s181_s30, 4294966272  ;;  %v208_v0 = vlaneseq  ;;  %v6661_v1 = vmov 0.0   ;;  %vm6662_vm0 = vmmov 0   ;;  %vm244_vm1 = vcmask 1041409   ;;  %v235_v10 = vld [vmem:[%s6779_s4] sm:$0x1] }
  0x2d   : > { %6088 = vmatprep.subr.mxu0 %v6661_v1  ;;  %6095 = vmatprep.subr.mxu1 %v6661_v1  ;;  %vm247_vm4 = vcmask 1042434   ;;  %v6663_v9 = vmov 1.0   ;;  %v236_v11 = vld [vmem:[%s6779_s4 + $0x10] sm:$0x1]  ;;  %v237_v12 = vld [vmem:[%s6779_s4 + $0x20] sm:$0x1] }
  0x2e   : > { %v6787_v2 = vshrl.u32 %v208_v0, 7  ;;  %v212_v3 = vand.u32 127, %v208_v0  ;;  %6092 = vmatprep.mubr.msk.f32.mxu0 %vm6662_vm0, %v6661_v1  ;;  %6099 = vmatprep.mubr.msk.f32.mxu1 %vm6662_vm0, %v6661_v1  ;;  %v238_v15 = vld [vmem:[%s6779_s4 + $0x30] sm:$0x1]  ;;  %v243_v16 = vrot.slane %v236_v11, 7  ;;  %v246_v17 = vrot.slane %v237_v12, 6 }
  0x2f   : > { %v249_v18 = vrot.slane %v238_v15, 5  ;;  %vm250_vm7 = vcmask 1043459   ;;  %vm252_vm8 = vcmask 130048   ;;  %v550_v22 = vld [vmem:[%s6779_s4 + $0x11] sm:$0x1]  ;;  %vm399_vm9 = vcmask 1043456  }
  0x30   : > { %v210_v4 = vadd.s32 8, %v6787_v2  ;;  %v213_v5 = vmul.u32 2, %v212_v3  ;;  %v245_v19 = vsel %vm244_vm1, %v243_v16, %v235_v10  ;;  %v551_v23 = vld [vmem:[%s6779_s4 + $0x21] sm:$0x1]  ;;  %v557_v24 = vrot.slane %v550_v22, 7  ;;  %v6849_v29 = vld [vmem:[%s7754_s1 + $0x8] sm:$0xff] }
  0x31   : > { %v248_v20 = vsel %vm247_vm4, %v246_v17, %v245_v19  ;;  %v549_v25 = vld [vmem:[%s6779_s4 + $0x1] sm:$0x1]  ;;  %v552_v26 = vld [vmem:[%s6779_s4 + $0x31] sm:$0x1]  ;;  %v559_v27 = vrot.slane %v551_v23, 6  ;;  %vm395_vm10 = vcmask 31744  }
  0x32   : > { %vm6794_vm2 = vcmp.eq.s32.totalorder %v210_v4, %v213_v5  ;;  %v220_v7 = vadd.s32 1, %v213_v5  ;;  %vm6799_vm3 = vcmp.eq.s32.totalorder %v6787_v2, %v213_v5  ;;  %v251_v21 = vsel %vm250_vm7, %v249_v18, %v248_v20  ;;  %v6854_v30 = vld [vmem:[%s7754_s1] sm:$0xff]  ;;  %v933_v38 = vld [vmem:[%s6779_s4 + $0x12] sm:$0x1]  ;;  %v6927_v58 = vld [vmem:[%s7754_s1 + $0x18] sm:$0xff]  ;;  %s6982_s21 = scalar_lea.vmem [#allocation5], %s5752_s29 }
  0x33   : > { %6089 = vmatpush3.msk.msra.mxu0 %vm6794_vm2, %v6663_v9  ;;  %v558_v28 = vsel %vm244_vm1, %v557_v24, %v549_v25  ;;  %v561_v33 = vrot.slane %v552_v26, 5  ;;  %v934_v39 = vld [vmem:[%s6779_s4 + $0x22] sm:$0x1]  ;;  %v940_v40 = vrot.slane %v933_v38, 7  ;;  %v935_v42 = vld [vmem:[%s6779_s4 + $0x32] sm:$0x1] }
  0x34   : > { %vm6809_vm5 = vcmp.eq.s32.totalorder %v210_v4, %v220_v7  ;;  %6090 = vmatprep.subr.mxu0 %v6661_v1  ;;  %vm6815_vm6 = vcmp.eq.s32.totalorder %v6787_v2, %v220_v7  ;;  %v560_v34 = vsel %vm247_vm4, %v559_v27, %v558_v28  ;;  %v932_v41 = vld [vmem:[%s6779_s4 + $0x2] sm:$0x1]  ;;  %v942_v43 = vrot.slane %v934_v39, 6  ;;  %v6916_v55 = vld [vmem:[%s7754_s1 + $0x10] sm:$0xff]  ;;  %v1236_v5 = vld [vmem:[%s6779_s4 + $0x23] sm:$0x1] }
  0x35   : > { %6096 = vmatpush3.msk.msra.mxu1 %vm6809_vm5, %v6663_v9  ;;  %6091 = vmatpush3.msk.msra.mxu0 %vm6799_vm3, %v6663_v9  ;;  %v562_v37 = vsel %vm250_vm7, %v561_v33, %v560_v34  ;;  %v941_v44 = vsel %vm244_vm1, %v940_v40, %v932_v41  ;;  %v944_v45 = vrot.slane %v935_v42, 5  ;;  %v234_v48 = vld [vmem:[%s7755_s2] sm:$0xff]  ;;  %v6664_v49 = vmov 0   ;;  %v1235_v3 = vld [vmem:[%s6779_s4 + $0x13] sm:$0x1]  ;;  %s5658_s8 = sshll.u32 %s6982_s21, 4  ;;  %s7697_s8 = int_to_ptr.vmem [resolvable:$true] %s5658_s8 }
  0x36   : > { %6097 = vmatprep.subr.mxu1 %v6661_v1  ;;  %6102 = vmatprep.subr.mxu0 %v6661_v1  ;;  %v943_v46 = vsel %vm247_vm4, %v942_v43, %v941_v44  ;;  %v6665_v63 = vmov 1966171168   ;;  %v1242_v7 = vrot.slane %v1235_v3, 7  ;;  %v1234_v11 = vld [vmem:[%s6779_s4 + $0x3] sm:$0x1]  ;;  %v1244_v17 = vrot.slane %v1236_v5, 6 }
  0x37   : > { %6098 = vmatpush3.msk.msra.mxu1 %vm6815_vm6, %v6663_v9  ;;  %6093 = vmatmul.mubr.msk.f32.vlgmr.msra.gmra.mxu0 %vm252_vm8, %v251_v21  ;;  %v945_v47 = vsel %vm250_vm7, %v944_v45, %v943_v46  ;;  %v868_v0 = vunpack.c.l.s4 %v6665_v63  ;;  %v1237_v16 = vld [vmem:[%s6779_s4 + $0x33] sm:$0x1]  ;;  %vm923_vm11 = vcmask 57344   ;;  %v1606_v46 = vld [vmem:[%s6779_s4 + $0x14] sm:$0x1]  ;;  %s6576_s18 = scalar_lea.vmem %s7697_s8, 1024 }
  0x38   : > { %6107 = vmatprep.subr.mxu1 %v6661_v1  ;;  %6100 = vmatmul.mubr.msk.f32.vlgmr.msra.gmra.mxu1 %vm252_vm8, %v251_v21  ;;  %v1243_v20 = vsel %vm244_vm1, %v1242_v7, %v1234_v11  ;;  %v1246_v24 = vrot.slane %v1237_v16, 5  ;;  %v1909_v7 = vld [vmem:[%s6779_s4 + $0x25] sm:$0x1]  ;;  %p6577_p8 = scmp.ne.s32.totalorder %s7697_s8, %s6576_s18  ;;  %s6666_s19 = smov [#allocation5]  }
  0x39   : > { %6104 = vmatprep.mubr.msk.f32.mxu0 %vm6662_vm0, %v6661_v1  ;;  %6109 = vmatprep.mubr.msk.f32.mxu1 %vm6662_vm0, %v6661_v1  ;;  %v869_v10 = vunpack.c.0.s8 %v868_v0  ;;  %v1245_v26 = vsel %vm247_vm4, %v1244_v17, %v1243_v20  ;;  %v1910_v17 = vld [vmem:[%s6779_s4 + $0x35] sm:$0x1]  ;;  %s6580_s22 = sshll.u32 %s6666_s19, 4  ;;  %s6581_s22 = int_to_ptr.vmem [resolvable:$false] %s6580_s22 }
  0x3a   : > { %6543 = vset.pattern.permute.xlu0 %v6664_v49  ;;  %v1605_v49 = vld [vmem:[%s6779_s4 + $0x4] sm:$0x1]  ;;  %p6578_p12 = pnand %p6577_p8, %p6740_p9  ;;  %s6582_s23 = scalar_lea.vmem %s6581_s22, 2048 }
  0x3b   : > { %861 = vperm.xlu0 %6543, %v234_v48   ;;  %v6960_v21 = vsub.s32 %v869_v10, %v6787_v2  ;;  %v1247_v2 = vsel %vm250_vm7, %v1246_v24, %v1245_v26  ;;  %v1613_v48 = vrot.slane %v1606_v46, 7  ;;  %p6583_p1 = scmp.lt.s32.totalorder %s7697_s8, %s6581_s22  ;;  %p6584_p3 = scmp.lt.s32.totalorder %s6582_s23, %s6576_s18 }
  0x3c   : > { %p6579_p0 = pneg %p6578_p12 }
  0x3d   : > { %p6585_p5 = por %p6584_p3, %p6583_p1 }
  0x3f   : > { %p6586_p6 = pnand %p6585_p5, %p6579_p0 }
  0xb6   : > { %v6956_v19 = vpop.permute.xlu0 %861 }
  0xf7   : > { %v321_v31 = vpop.f32.mrf.mxu0 }
  0xf8   : > { %v391_v32 = vpop.f32.mrf.mxu1  ;;  %6108 = vmatpush3.msk.msra.mxu1 %vm399_vm9, %v321_v31 }
  0xf9   : > { %6103 = vmatpush3.msk.msra.mxu0 %vm399_vm9, %v391_v32  ;;  %6110 = vmatmul.mubr.msk.f32.vlgmr.msra.gmra.mxu1 %vm395_vm10, %v6854_v30  ;;  %v6094_v36 = vpop.f32.mrf.mxu0 }
  0xfa   : > { %v6101_v35 = vpop.f32.mrf.mxu1  ;;  %6105 = vmatmul.mubr.msk.f32.vlgmr.msra.gmra.mxu0 %vm395_vm10, %v6849_v29  ;;  %6112 = vmatprep.subr.mxu0 %v6661_v1 }
  0xfb   : > { %6116 = vmatprep.mubr.msk.f32.mxu0 %vm6662_vm0, %v6661_v1  ;;  %6113 = vmatpush3.msk.msra.mxu0 %vm6794_vm2, %v6663_v9 }
  0xfc   : > { %6119 = vmatprep.subr.mxu1 %v6661_v1  ;;  %6114 = vmatprep.subr.mxu0 %v6661_v1 }
  0xfd   : > { %6121 = vmatprep.mubr.msk.f32.mxu1 %vm6662_vm0, %v6661_v1  ;;  %6115 = vmatpush3.msk.msra.mxu0 %vm6799_vm3, %v6663_v9 }
  0xfe   : > { %6117 = vmatmul.mubr.msk.f32.vlgmr.msra.gmra.mxu0 %vm252_vm8, %v562_v37  ;;  %6124 = vmatprep.subr.mxu0 %v6661_v1 }
  0xff   : > { %6125 = vmatpush3.msk.msra.mxu0 %vm6809_vm5, %v6663_v9  ;;  %6128 = vmatprep.mubr.msk.f32.mxu0 %vm6662_vm0, %v6661_v1 }
 0x100   : > { %6126 = vmatprep.subr.mxu0 %v6661_v1 }
 0x101   : > { %6127 = vmatpush3.msk.msra.mxu0 %vm6815_vm6, %v6663_v9 }
 0x102   : > { %6129 = vmatmul.mubr.msk.f32.vlgmr.msra.gmra.mxu0 %vm252_vm8, %v562_v37  ;;  %6136 = vmatprep.subr.mxu0 %v6661_v1 }
 0x103   : > { %6137 = vmatpush3.msk.msra.mxu0 %vm6794_vm2, %v6663_v9  ;;  %6140 = vmatprep.mubr.msk.f32.mxu0 %vm6662_vm0, %v6661_v1 }
 0x104   : > { %6138 = vmatprep.subr.mxu0 %v6661_v1 }
 0x105   : > { %6139 = vmatpush3.msk.msra.mxu0 %vm6799_vm3, %v6663_v9 }
 0x106   : > { %6150 = vmatprep.subr.mxu0 %v6661_v1  ;;  %6141 = vmatmul.mubr.msk.f32.vlgmr.msra.gmra.mxu0 %vm252_vm8, %v945_v47 }
 0x107   : > { %6152 = vmatprep.mubr.msk.f32.mxu0 %vm6662_vm0, %v6661_v1 }
 0x1b9   : > { %v545_v51 = vpop.f32.mrf.mxu1 }
 0x1ba   : > { %v469_v50 = vpop.f32.mrf.mxu0 }
 0x1bb   : > { %v546_v52 = vadd.f32 %v545_v51, %v469_v50  ;;  %v6111_v54 = vpop.f32.mrf.mxu1  ;;  %v1608_v50 = vld [vmem:[%s6779_s4 + $0x34] sm:$0x1] }
 0x1bc   : > { %v6106_v53 = vpop.f32.mrf.mxu0 }
 0x1bd   : > { %v1617_v53 = vrot.slane %v1608_v50, 5  ;;  %v2278_v50 = vld [vmem:[%s6779_s4 + $0x6] sm:$0x1] }
 0x1be   : > { %v631_v56 = vpop.f32.mrf.mxu0 }
 0x1bf   : > { %6120 = vmatpush3.msk.msra.mxu1 %vm399_vm9, %v631_v56 }
 0x1c0   : > { %v6118_v57 = vpop.f32.mrf.mxu0  ;;  %6122 = vmatmul.mubr.msk.f32.vlgmr.msra.gmra.mxu1 %vm395_vm10, %v6916_v55  ;;  %6131 = vmatprep.subr.mxu1 %v6661_v1 }
 0x1c1   : > { %6133 = vmatprep.mubr.msk.f32.mxu1 %vm6662_vm0, %v6661_v1 }
 0x1c2   : > { %v778_v59 = vpop.f32.mrf.mxu0 }
 0x1c3   : > { %6132 = vmatpush3.msk.msra.mxu1 %vm399_vm9, %v778_v59 }
 0x1c4   : > { %v6130_v60 = vpop.f32.mrf.mxu0  ;;  %6134 = vmatmul.mubr.msk.f32.vlgmr.msra.gmra.mxu1 %vm395_vm10, %v6927_v58  ;;  %6143 = vmatprep.subr.mxu1 %v6661_v1 }
 0x1c5   : > { %6144 = vmatpush3.msk.msra.mxu1 %vm6809_vm5, %v6663_v9  ;;  %6147 = vmatprep.mubr.msk.f32.mxu1 %vm6662_vm0, %v6661_v1 }
 0x1c6   : > { %6145 = vmatprep.subr.mxu1 %v6661_v1  ;;  %v1014_v61 = vpop.f32.mrf.mxu0 }
 0x1c7   : > { %6146 = vmatpush3.msk.msra.mxu1 %vm6815_vm6, %v6663_v9 }
 0x1c8   : > { %6148 = vmatmul.mubr.msk.f32.vlgmr.msra.gmra.mxu1 %vm252_vm8, %v945_v47  ;;  %6155 = vmatprep.subr.mxu1 %v6661_v1  ;;  %v6142_v62 = vpop.f32.mrf.mxu0  ;;  %v1607_v47 = vld [vmem:[%s6779_s4 + $0x24] sm:$0x1] }
 0x1c9   : > { %6157 = vmatprep.mubr.msk.f32.mxu1 %vm6662_vm0, %v6661_v1  ;;  %6156 = vmatpush3.msk.msra.mxu1 %vm399_vm9, %v1014_v61  ;;  %v1615_v51 = vrot.slane %v1607_v47, 6  ;;  %v2279_v47 = vld [vmem:[%s6779_s4 + $0x16] sm:$0x1] }
 0x1ca   : > { %6167 = vmatprep.subr.mxu1 %v6661_v1 }
 0x1cc   : > { %6158 = vmatmul.mubr.msk.f32.vlgmr.msra.gmra.mxu1 %vm395_vm10, %v6854_v30 }
 0x1cd   : > { %6169 = vmatprep.mubr.msk.f32.mxu1 %vm6662_vm0, %v6661_v1 }
 0x280   : > { %v707_v4 = vpop.f32.mrf.mxu1 }
 0x281   : > { %v711_v15 = vadd.f32 %v707_v4, %v546_v52  ;;  %v1614_v52 = vsel %vm244_vm1, %v1613_v48, %v1605_v49  ;;  %v1908_v4 = vld [vmem:[%s6779_s4 + $0x15] sm:$0x1]  ;;  %v2280_v48 = vld [vmem:[%s6779_s4 + $0x26] sm:$0x1]  ;;  %v2286_v49 = vrot.slane %v2279_v47, 7 }
 0x282   : > { %v6123_v12 = vpop.f32.mrf.mxu1  ;;  %v1616_v54 = vsel %vm247_vm4, %v1615_v51, %v1614_v52  ;;  %v1915_v10 = vrot.slane %v1908_v4, 7  ;;  %v2281_v51 = vld [vmem:[%s6779_s4 + $0x36] sm:$0x1]  ;;  %v2288_v52 = vrot.slane %v2280_v48, 6  ;;  %v2952_v48 = vld [vmem:[%s6779_s4 + $0x18] sm:$0x1] }
 0x283   : > { %v1618_v56 = vsel %vm250_vm7, %v1617_v53, %v1616_v54  ;;  %v1907_v12 = vld [vmem:[%s6779_s4 + $0x5] sm:$0x1]  ;;  %v2287_v53 = vsel %vm244_vm1, %v2286_v49, %v2278_v50  ;;  %v2290_v54 = vrot.slane %v2281_v51, 5  ;;  %v2953_v49 = vld [vmem:[%s6779_s4 + $0x28] sm:$0x1]  ;;  %v2959_v50 = vrot.slane %v2952_v48, 7 }
 0x284   : > { %v854_v18 = vpop.f32.mrf.mxu1  ;;  %v2951_v51 = vld [vmem:[%s6779_s4 + $0x8] sm:$0x1]  ;;  %v3625_v48 = vld [vmem:[%s6779_s4 + $0x1a] sm:$0x1] }
 0x285   : > { %v858_v22 = vadd.f32 %v854_v18, %v711_v15  ;;  %v1917_v18 = vrot.slane %v1909_v7, 6 }
 0x286   : > { %v6135_v23 = vpop.f32.mrf.mxu1 }
 0x287   : > { %v864_v25 = vadd.f32 %v6956_v19, %v858_v22  ;;  %v1916_v22 = vsel %vm244_vm1, %v1915_v10, %v1907_v12  ;;  %v2582_v10 = vld [vmem:[%s6779_s4 + $0x27] sm:$0x1] }
 0x288   : > { %v1084_v27 = vpop.f32.mrf.mxu1 }
 0x289   : > { %v866_v28 = vcombine.high %v864_v25, %v864_v25  ;;  %v873_v31 = vrot.slane %v864_v25, %v6960_v21  ;;  %6151 = vmatpush3.msk.msra.mxu0 %vm399_vm9, %v1084_v27  ;;  %v1919_v25 = vrot.slane %v1910_v17, 5  ;;  %v1918_v27 = vsel %vm247_vm4, %v1917_v18, %v1916_v22  ;;  %v2583_v18 = vld [vmem:[%s6779_s4 + $0x37] sm:$0x1] }
 0x28a   : > { %v6149_v32 = vpop.f32.mrf.mxu1  ;;  %6153 = vmatmul.mubr.msk.f32.vlgmr.msra.gmra.mxu0 %vm395_vm10, %v6849_v29  ;;  %6160 = vmatprep.subr.mxu0 %v6661_v1 }
 0x28b   : > { %v880_v33 = vrot.slane %v866_v28, %v6960_v21  ;;  %v881_v34 = vcombine.high %v873_v31, %v873_v31  ;;  %v889_v35 = vrot.slane %v873_v31, %v6960_v21  ;;  %6161 = vmatpush3.msk.msra.mxu0 %vm6794_vm2, %v6663_v9  ;;  %6164 = vmatprep.mubr.msk.f32.mxu0 %vm6662_vm0, %v6661_v1 }
 0x28c   : > { %6162 = vmatprep.subr.mxu0 %v6661_v1  ;;  %v1230_v44 = vpop.f32.mrf.mxu1 }
 0x28d   : > { %v882_v36 = vcombine.high %v880_v33, %v880_v33  ;;  %v896_v37 = vrot.slane %v880_v33, %v6960_v21  ;;  %v903_v38 = vrot.slane %v881_v34, %v6960_v21  ;;  %v911_v39 = vcombine.high %v889_v35, %v889_v35  ;;  %924 = vst.msk [vmem:[%s6982_s21] sm:$0x1] %vm923_vm11, %v889_v35 }
 0x28e   : > { %6163 = vmatpush3.msk.msra.mxu0 %vm6799_vm3, %v6663_v9  ;;  %v6159_v45 = vpop.f32.mrf.mxu1  ;;  %v1920_v33 = vsel %vm250_vm7, %v1919_v25, %v1918_v27 }
 0x28f   : > { %6165 = vmatmul.mubr.msk.f32.vlgmr.msra.gmra.mxu0 %vm252_vm8, %v1247_v2  ;;  %6172 = vmatprep.subr.mxu0 %v6661_v1  ;;  %v910_v40 = vrot.slane %v882_v36, %v6960_v21  ;;  %v912_v41 = vcombine.high %v896_v37, %v896_v37  ;;  %v913_v42 = vcombine.high %v903_v38, %v903_v38 }
 0x290   : > { %925 = vst.msk [vmem:[%s6982_s21 + $0x8] sm:$0x1] %vm923_vm11, %v903_v38  ;;  %926 = vst.msk [vmem:[%s6982_s21 + $0x10] sm:$0x1] %vm923_vm11, %v911_v39  ;;  %6173 = vmatpush3.msk.msra.mxu0 %vm6809_vm5, %v6663_v9  ;;  %6176 = vmatprep.mubr.msk.f32.mxu0 %vm6662_vm0, %v6661_v1 }
 0x291   : > { %928 = vst.msk [vmem:[%s6982_s21 + $0x20] sm:$0x1] %vm923_vm11, %v896_v37  ;;  %6174 = vmatprep.subr.mxu0 %v6661_v1  ;;  %v914_v43 = vcombine.high %v910_v40, %v910_v40  ;;  %927 = vst.msk [vmem:[%s6982_s21 + $0x18] sm:$0x1] %vm923_vm11, %v913_v42 }
 0x292   : > { %929 = vst.msk [vmem:[%s6982_s21 + $0x28] sm:$0x1] %vm923_vm11, %v910_v40  ;;  %930 = vst.msk [vmem:[%s6982_s21 + $0x30] sm:$0x1] %vm923_vm11, %v912_v41  ;;  %6175 = vmatpush3.msk.msra.mxu0 %vm6815_vm6, %v6663_v9 }
 0x293   : > { %6177 = vmatmul.mubr.msk.f32.vlgmr.msra.gmra.mxu0 %vm252_vm8, %v1247_v2  ;;  %6184 = vmatprep.subr.mxu0 %v6661_v1  ;;  %931 = vst.msk [vmem:[%s6982_s21 + $0x38] sm:$0x1] %vm923_vm11, %v914_v43 }
 0x294   : > { %6185 = vmatpush3.msk.msra.mxu0 %vm6794_vm2, %v6663_v9  ;;  %6188 = vmatprep.mubr.msk.f32.mxu0 %vm6662_vm0, %v6661_v1 }
 0x295   : > { %6186 = vmatprep.subr.mxu0 %v6661_v1 }
 0x296   : > { %6187 = vmatpush3.msk.msra.mxu0 %vm6799_vm3, %v6663_v9 }
 0x297   : > { %6198 = vmatprep.subr.mxu0 %v6661_v1  ;;  %6189 = vmatmul.mubr.msk.f32.vlgmr.msra.gmra.mxu0 %vm252_vm8, %v1618_v56 }
 0x298   : > { %6200 = vmatprep.mubr.msk.f32.mxu0 %vm6662_vm0, %v6661_v1 }
 0x34a   : > { %v1157_v57 = vpop.f32.mrf.mxu0 }
 0x34b   : > { %v1231_v11 = vadd.f32 %v1230_v44, %v1157_v57 }
 0x34c   : > { %v6154_v59 = vpop.f32.mrf.mxu0 }
 0x34f   : > { %v1316_v60 = vpop.f32.mrf.mxu0 }
 0x350   : > { %6168 = vmatpush3.msk.msra.mxu1 %vm399_vm9, %v1316_v60 }
 0x351   : > { %v6166_v61 = vpop.f32.mrf.mxu0  ;;  %6170 = vmatmul.mubr.msk.f32.vlgmr.msra.gmra.mxu1 %vm395_vm10, %v6916_v55  ;;  %6179 = vmatprep.subr.mxu1 %v6661_v1 }
 0x352   : > { %6181 = vmatprep.mubr.msk.f32.mxu1 %vm6662_vm0, %v6661_v1 }
 0x353   : > { %v1460_v62 = vpop.f32.mrf.mxu0 }
 0x354   : > { %6180 = vmatpush3.msk.msra.mxu1 %vm399_vm9, %v1460_v62 }
 0x355   : > { %v6178_v63 = vpop.f32.mrf.mxu0  ;;  %6182 = vmatmul.mubr.msk.f32.vlgmr.msra.gmra.mxu1 %vm395_vm10, %v6927_v58  ;;  %6191 = vmatprep.subr.mxu1 %v6661_v1 }
 0x356   : > { %6192 = vmatpush3.msk.msra.mxu1 %vm6809_vm5, %v6663_v9  ;;  %6195 = vmatprep.mubr.msk.f32.mxu1 %vm6662_vm0, %v6661_v1 }
 0x357   : > { %6193 = vmatprep.subr.mxu1 %v6661_v1  ;;  %v1687_v0 = vpop.f32.mrf.mxu0 }
 0x358   : > { %6194 = vmatpush3.msk.msra.mxu1 %vm6815_vm6, %v6663_v9 }
 0x359   : > { %6196 = vmatmul.mubr.msk.f32.vlgmr.msra.gmra.mxu1 %vm252_vm8, %v1618_v56  ;;  %6203 = vmatprep.subr.mxu1 %v6661_v1  ;;  %v6190_v3 = vpop.f32.mrf.mxu0  ;;  %v2289_v56 = vsel %vm247_vm4, %v2288_v52, %v2287_v53  ;;  %v2954_v52 = vld [vmem:[%s6779_s4 + $0x38] sm:$0x1]  ;;  %v2961_v53 = vrot.slane %v2953_v49, 6  ;;  %v3626_v49 = vld [vmem:[%s6779_s4 + $0x2a] sm:$0x1] }
 0x35a   : > { %6205 = vmatprep.mubr.msk.f32.mxu1 %vm6662_vm0, %v6661_v1  ;;  %6204 = vmatpush3.msk.msra.mxu1 %vm399_vm9, %v1687_v0  ;;  %v2291_v57 = vsel %vm250_vm7, %v2290_v54, %v2289_v56  ;;  %v2960_v54 = vsel %vm244_vm1, %v2959_v50, %v2951_v51  ;;  %v2963_v56 = vrot.slane %v2954_v52, 5  ;;  %v3632_v50 = vrot.slane %v3625_v48, 7  ;;  %v3624_v51 = vld [vmem:[%s6779_s4 + $0xa] sm:$0x1]  ;;  %v3627_v52 = vld [vmem:[%s6779_s4 + $0x3a] sm:$0x1] }
 0x35b   : > { %6215 = vmatprep.subr.mxu1 %v6661_v1 }
 0x35d   : > { %6206 = vmatmul.mubr.msk.f32.vlgmr.msra.gmra.mxu1 %vm395_vm10, %v6854_v30 }
 0x35e   : > { %6217 = vmatprep.mubr.msk.f32.mxu1 %vm6662_vm0, %v6661_v1 }
 0x411   : > { %v1389_v5 = vpop.f32.mrf.mxu1 }
 0x412   : > { %v1393_v16 = vadd.f32 %v1389_v5, %v1231_v11  ;;  %v2581_v5 = vld [vmem:[%s6779_s4 + $0x17] sm:$0x1] }
 0x413   : > { %v6171_v15 = vpop.f32.mrf.mxu1  ;;  %v2588_v11 = vrot.slane %v2581_v5, 7 }
 0x414   : > { %v2580_v15 = vld [vmem:[%s6779_s4 + $0x7] sm:$0x1] }
 0x415   : > { %v1533_v20 = vpop.f32.mrf.mxu1 }
 0x416   : > { %v1537_v23 = vadd.f32 %v1533_v20, %v1393_v16  ;;  %v2590_v20 = vrot.slane %v2582_v10, 6 }
 0x417   : > { %v6183_v24 = vpop.f32.mrf.mxu1 }
 0x418   : > { %v1538_v26 = vadd.f32 %v1537_v23, %v6956_v19  ;;  %v2589_v23 = vsel %vm244_vm1, %v2588_v11, %v2580_v15  ;;  %v3255_v11 = vld [vmem:[%s6779_s4 + $0x29] sm:$0x1] }
 0x419   : > { %v1757_v28 = vpop.f32.mrf.mxu1 }
 0x41a   : > { %v1540_v31 = vcombine.high %v1538_v26, %v1538_v26  ;;  %v1547_v32 = vrot.slane %v1538_v26, %v6960_v21  ;;  %6199 = vmatpush3.msk.msra.mxu0 %vm399_vm9, %v1757_v28  ;;  %v2592_v26 = vrot.slane %v2583_v18, 5  ;;  %v2591_v28 = vsel %vm247_vm4, %v2590_v20, %v2589_v23  ;;  %v3256_v20 = vld [vmem:[%s6779_s4 + $0x39] sm:$0x1] }
 0x41b   : > { %v6197_v2 = vpop.f32.mrf.mxu1  ;;  %6201 = vmatmul.mubr.msk.f32.vlgmr.msra.gmra.mxu0 %vm395_vm10, %v6849_v29  ;;  %6208 = vmatprep.subr.mxu0 %v6661_v1 }
 0x41c   : > { %v1554_v34 = vrot.slane %v1540_v31, %v6960_v21  ;;  %v1555_v35 = vcombine.high %v1547_v32, %v1547_v32  ;;  %v1563_v36 = vrot.slane %v1547_v32, %v6960_v21  ;;  %6209 = vmatpush3.msk.msra.mxu0 %vm6794_vm2, %v6663_v9  ;;  %6212 = vmatprep.mubr.msk.f32.mxu0 %vm6662_vm0, %v6661_v1 }
 0x41d   : > { %6210 = vmatprep.subr.mxu0 %v6661_v1  ;;  %v1903_v45 = vpop.f32.mrf.mxu1 }
 0x41e   : > { %v1556_v37 = vcombine.high %v1554_v34, %v1554_v34  ;;  %v1570_v38 = vrot.slane %v1554_v34, %v6960_v21  ;;  %v1577_v39 = vrot.slane %v1555_v35, %v6960_v21  ;;  %v1585_v40 = vcombine.high %v1563_v36, %v1563_v36  ;;  %1597 = vst.msk [vmem:[%s6982_s21 + $0x1] sm:$0x1] %vm923_vm11, %v1563_v36 }
 0x41f   : > { %6211 = vmatpush3.msk.msra.mxu0 %vm6799_vm3, %v6663_v9  ;;  %v6207_v46 = vpop.f32.mrf.mxu1  ;;  %v2593_v34 = vsel %vm250_vm7, %v2592_v26, %v2591_v28 }
 0x420   : > { %6213 = vmatmul.mubr.msk.f32.vlgmr.msra.gmra.mxu0 %vm252_vm8, %v1920_v33  ;;  %6220 = vmatprep.subr.mxu0 %v6661_v1  ;;  %v1584_v41 = vrot.slane %v1556_v37, %v6960_v21  ;;  %v1586_v42 = vcombine.high %v1570_v38, %v1570_v38  ;;  %v1587_v43 = vcombine.high %v1577_v39, %v1577_v39 }
 0x421   : > { %1598 = vst.msk [vmem:[%s6982_s21 + $0x9] sm:$0x1] %vm923_vm11, %v1577_v39  ;;  %1599 = vst.msk [vmem:[%s6982_s21 + $0x11] sm:$0x1] %vm923_vm11, %v1585_v40  ;;  %6221 = vmatpush3.msk.msra.mxu0 %vm6809_vm5, %v6663_v9  ;;  %6224 = vmatprep.mubr.msk.f32.mxu0 %vm6662_vm0, %v6661_v1 }
 0x422   : > { %1601 = vst.msk [vmem:[%s6982_s21 + $0x21] sm:$0x1] %vm923_vm11, %v1570_v38  ;;  %6222 = vmatprep.subr.mxu0 %v6661_v1  ;;  %v1588_v44 = vcombine.high %v1584_v41, %v1584_v41  ;;  %1600 = vst.msk [vmem:[%s6982_s21 + $0x19] sm:$0x1] %vm923_vm11, %v1587_v43 }
 0x423   : > { %1602 = vst.msk [vmem:[%s6982_s21 + $0x29] sm:$0x1] %vm923_vm11, %v1584_v41  ;;  %1603 = vst.msk [vmem:[%s6982_s21 + $0x31] sm:$0x1] %vm923_vm11, %v1586_v42  ;;  %6223 = vmatpush3.msk.msra.mxu0 %vm6815_vm6, %v6663_v9 }
 0x424   : > { %6225 = vmatmul.mubr.msk.f32.vlgmr.msra.gmra.mxu0 %vm252_vm8, %v1920_v33  ;;  %6232 = vmatprep.subr.mxu0 %v6661_v1  ;;  %1604 = vst.msk [vmem:[%s6982_s21 + $0x39] sm:$0x1] %vm923_vm11, %v1588_v44 }
 0x425   : > { %6233 = vmatpush3.msk.msra.mxu0 %vm6794_vm2, %v6663_v9  ;;  %6236 = vmatprep.mubr.msk.f32.mxu0 %vm6662_vm0, %v6661_v1 }
 0x426   : > { %6234 = vmatprep.subr.mxu0 %v6661_v1 }
 0x427   : > { %6235 = vmatpush3.msk.msra.mxu0 %vm6799_vm3, %v6663_v9 }
 0x428   : > { %6246 = vmatprep.subr.mxu0 %v6661_v1  ;;  %6237 = vmatmul.mubr.msk.f32.vlgmr.msra.gmra.mxu0 %vm252_vm8, %v2291_v57 }
 0x429   : > { %6248 = vmatprep.mubr.msk.f32.mxu0 %vm6662_vm0, %v6661_v1 }
 0x4db   : > { %v1830_v59 = vpop.f32.mrf.mxu0 }
 0x4dc   : > { %v1904_v12 = vadd.f32 %v1903_v45, %v1830_v59 }
 0x4dd   : > { %v6202_v60 = vpop.f32.mrf.mxu0 }
 0x4e0   : > { %v1989_v61 = vpop.f32.mrf.mxu0 }
 0x4e1   : > { %6216 = vmatpush3.msk.msra.mxu1 %vm399_vm9, %v1989_v61 }
 0x4e2   : > { %v6214_v62 = vpop.f32.mrf.mxu0  ;;  %6218 = vmatmul.mubr.msk.f32.vlgmr.msra.gmra.mxu1 %vm395_vm10, %v6916_v55  ;;  %6227 = vmatprep.subr.mxu1 %v6661_v1 }
 0x4e3   : > { %6229 = vmatprep.mubr.msk.f32.mxu1 %vm6662_vm0, %v6661_v1 }
 0x4e4   : > { %v2133_v63 = vpop.f32.mrf.mxu0 }
 0x4e5   : > { %6228 = vmatpush3.msk.msra.mxu1 %vm399_vm9, %v2133_v63 }
 0x4e6   : > { %v6226_v0 = vpop.f32.mrf.mxu0  ;;  %6230 = vmatmul.mubr.msk.f32.vlgmr.msra.gmra.mxu1 %vm395_vm10, %v6927_v58  ;;  %6239 = vmatprep.subr.mxu1 %v6661_v1 }
 0x4e7   : > { %6240 = vmatpush3.msk.msra.mxu1 %vm6809_vm5, %v6663_v9  ;;  %6243 = vmatprep.mubr.msk.f32.mxu1 %vm6662_vm0, %v6661_v1 }
 0x4e8   : > { %6241 = vmatprep.subr.mxu1 %v6661_v1  ;;  %v2360_v3 = vpop.f32.mrf.mxu0 }
 0x4e9   : > { %6242 = vmatpush3.msk.msra.mxu1 %vm6815_vm6, %v6663_v9 }
 0x4ea   : > { %6244 = vmatmul.mubr.msk.f32.vlgmr.msra.gmra.mxu1 %vm252_vm8, %v2291_v57  ;;  %6251 = vmatprep.subr.mxu1 %v6661_v1  ;;  %v6238_v4 = vpop.f32.mrf.mxu0  ;;  %v2962_v57 = vsel %vm247_vm4, %v2961_v53, %v2960_v54  ;;  %v3634_v53 = vrot.slane %v3626_v49, 6  ;;  %v3633_v54 = vsel %vm244_vm1, %v3632_v50, %v3624_v51  ;;  %v4297_v49 = vld [vmem:[%s6779_s4 + $0xc] sm:$0x1]  ;;  %v4300_v50 = vld [vmem:[%s6779_s4 + $0x3c] sm:$0x1] }
 0x4eb   : > { %6253 = vmatprep.mubr.msk.f32.mxu1 %vm6662_vm0, %v6661_v1  ;;  %6252 = vmatpush3.msk.msra.mxu1 %vm399_vm9, %v2360_v3  ;;  %v2964_v59 = vsel %vm250_vm7, %v2963_v56, %v2962_v57  ;;  %v3636_v56 = vrot.slane %v3627_v52, 5 }
 0x4ec   : > { %6263 = vmatprep.subr.mxu1 %v6661_v1  ;;  %v3635_v57 = vsel %vm247_vm4, %v3634_v53, %v3633_v54  ;;  %v4309_v53 = vrot.slane %v4300_v50, 5  ;;  %v4970_v50 = vld [vmem:[%s6779_s4 + $0xe] sm:$0x1] }
 0x4ee   : > { %6254 = vmatmul.mubr.msk.f32.vlgmr.msra.gmra.mxu1 %vm395_vm10, %v6854_v30 }
 0x4ef   : > { %6265 = vmatprep.mubr.msk.f32.mxu1 %vm6662_vm0, %v6661_v1 }
 0x5a2   : > { %v2062_v7 = vpop.f32.mrf.mxu1 }
 0x5a3   : > { %v2066_v17 = vadd.f32 %v2062_v7, %v1904_v12  ;;  %v3254_v7 = vld [vmem:[%s6779_s4 + $0x19] sm:$0x1] }
 0x5a4   : > { %v6219_v16 = vpop.f32.mrf.mxu1  ;;  %v3261_v12 = vrot.slane %v3254_v7, 7  ;;  %v3928_v7 = vld [vmem:[%s6779_s4 + $0x2b] sm:$0x1] }
 0x5a5   : > { %v3253_v16 = vld [vmem:[%s6779_s4 + $0x9] sm:$0x1] }
 0x5a6   : > { %v2206_v22 = vpop.f32.mrf.mxu1 }
 0x5a7   : > { %v2210_v24 = vadd.f32 %v2206_v22, %v2066_v17  ;;  %v3263_v22 = vrot.slane %v3255_v11, 6 }
 0x5a8   : > { %v6231_v25 = vpop.f32.mrf.mxu1 }
 0x5a9   : > { %v2211_v27 = vadd.f32 %v2210_v24, %v6956_v19  ;;  %v3262_v24 = vsel %vm244_vm1, %v3261_v12, %v3253_v16  ;;  %v3926_v12 = vld [vmem:[%s6779_s4 + $0xb] sm:$0x1] }
 0x5aa   : > { %v2430_v31 = vpop.f32.mrf.mxu1 }
 0x5ab   : > { %v2213_v32 = vcombine.high %v2211_v27, %v2211_v27  ;;  %v2220_v2 = vrot.slane %v2211_v27, %v6960_v21  ;;  %6247 = vmatpush3.msk.msra.mxu0 %vm399_vm9, %v2430_v31  ;;  %v3265_v27 = vrot.slane %v3256_v20, 5  ;;  %v3264_v31 = vsel %vm247_vm4, %v3263_v22, %v3262_v24 }
 0x5ac   : > { %v6245_v33 = vpop.f32.mrf.mxu1  ;;  %6249 = vmatmul.mubr.msk.f32.vlgmr.msra.gmra.mxu0 %vm395_vm10, %v6849_v29  ;;  %6256 = vmatprep.subr.mxu0 %v6661_v1 }
 0x5ad   : > { %v2227_v35 = vrot.slane %v2213_v32, %v6960_v21  ;;  %v2228_v36 = vcombine.high %v2220_v2, %v2220_v2  ;;  %v2236_v37 = vrot.slane %v2220_v2, %v6960_v21  ;;  %6257 = vmatpush3.msk.msra.mxu0 %vm6794_vm2, %v6663_v9  ;;  %6260 = vmatprep.mubr.msk.f32.mxu0 %vm6662_vm0, %v6661_v1 }
 0x5ae   : > { %6258 = vmatprep.subr.mxu0 %v6661_v1  ;;  %v2576_v46 = vpop.f32.mrf.mxu1 }
 0x5af   : > { %v2229_v38 = vcombine.high %v2227_v35, %v2227_v35  ;;  %v2243_v39 = vrot.slane %v2227_v35, %v6960_v21  ;;  %v2250_v40 = vrot.slane %v2228_v36, %v6960_v21  ;;  %v2258_v41 = vcombine.high %v2236_v37, %v2236_v37  ;;  %2270 = vst.msk [vmem:[%s6982_s21 + $0x2] sm:$0x1] %vm923_vm11, %v2236_v37 }
 0x5b0   : > { %6259 = vmatpush3.msk.msra.mxu0 %vm6799_vm3, %v6663_v9  ;;  %v6255_v47 = vpop.f32.mrf.mxu1  ;;  %v3266_v35 = vsel %vm250_vm7, %v3265_v27, %v3264_v31 }
 0x5b1   : > { %6261 = vmatmul.mubr.msk.f32.vlgmr.msra.gmra.mxu0 %vm252_vm8, %v2593_v34  ;;  %6268 = vmatprep.subr.mxu0 %v6661_v1  ;;  %v2257_v42 = vrot.slane %v2229_v38, %v6960_v21  ;;  %v2259_v43 = vcombine.high %v2243_v39, %v2243_v39  ;;  %v2260_v44 = vcombine.high %v2250_v40, %v2250_v40 }
 0x5b2   : > { %2271 = vst.msk [vmem:[%s6982_s21 + $0xa] sm:$0x1] %vm923_vm11, %v2250_v40  ;;  %2272 = vst.msk [vmem:[%s6982_s21 + $0x12] sm:$0x1] %vm923_vm11, %v2258_v41  ;;  %6269 = vmatpush3.msk.msra.mxu0 %vm6809_vm5, %v6663_v9  ;;  %6272 = vmatprep.mubr.msk.f32.mxu0 %vm6662_vm0, %v6661_v1 }
 0x5b3   : > { %2274 = vst.msk [vmem:[%s6982_s21 + $0x22] sm:$0x1] %vm923_vm11, %v2243_v39  ;;  %6270 = vmatprep.subr.mxu0 %v6661_v1  ;;  %v2261_v45 = vcombine.high %v2257_v42, %v2257_v42  ;;  %2273 = vst.msk [vmem:[%s6982_s21 + $0x1a] sm:$0x1] %vm923_vm11, %v2260_v44 }
 0x5b4   : > { %2275 = vst.msk [vmem:[%s6982_s21 + $0x2a] sm:$0x1] %vm923_vm11, %v2257_v42  ;;  %2276 = vst.msk [vmem:[%s6982_s21 + $0x32] sm:$0x1] %vm923_vm11, %v2259_v43  ;;  %6271 = vmatpush3.msk.msra.mxu0 %vm6815_vm6, %v6663_v9 }
 0x5b5   : > { %6273 = vmatmul.mubr.msk.f32.vlgmr.msra.gmra.mxu0 %vm252_vm8, %v2593_v34  ;;  %6280 = vmatprep.subr.mxu0 %v6661_v1  ;;  %2277 = vst.msk [vmem:[%s6982_s21 + $0x3a] sm:$0x1] %vm923_vm11, %v2261_v45 }
 0x5b6   : > { %6281 = vmatpush3.msk.msra.mxu0 %vm6794_vm2, %v6663_v9  ;;  %6284 = vmatprep.mubr.msk.f32.mxu0 %vm6662_vm0, %v6661_v1 }
 0x5b7   : > { %6282 = vmatprep.subr.mxu0 %v6661_v1 }
 0x5b8   : > { %6283 = vmatpush3.msk.msra.mxu0 %vm6799_vm3, %v6663_v9 }
 0x5b9   : > { %6294 = vmatprep.subr.mxu0 %v6661_v1  ;;  %6285 = vmatmul.mubr.msk.f32.vlgmr.msra.gmra.mxu0 %vm252_vm8, %v2964_v59 }
 0x5ba   : > { %6296 = vmatprep.mubr.msk.f32.mxu0 %vm6662_vm0, %v6661_v1 }
 0x66c   : > { %v2503_v60 = vpop.f32.mrf.mxu0 }
 0x66d   : > { %v2577_v15 = vadd.f32 %v2576_v46, %v2503_v60 }
 0x66e   : > { %v6250_v61 = vpop.f32.mrf.mxu0 }
 0x671   : > { %v2662_v62 = vpop.f32.mrf.mxu0 }
 0x672   : > { %6264 = vmatpush3.msk.msra.mxu1 %vm399_vm9, %v2662_v62 }
 0x673   : > { %v6262_v63 = vpop.f32.mrf.mxu0  ;;  %6266 = vmatmul.mubr.msk.f32.vlgmr.msra.gmra.mxu1 %vm395_vm10, %v6916_v55  ;;  %6275 = vmatprep.subr.mxu1 %v6661_v1 }
 0x674   : > { %6277 = vmatprep.mubr.msk.f32.mxu1 %vm6662_vm0, %v6661_v1 }
 0x675   : > { %v2806_v0 = vpop.f32.mrf.mxu0 }
 0x676   : > { %6276 = vmatpush3.msk.msra.mxu1 %vm399_vm9, %v2806_v0 }
 0x677   : > { %v6274_v3 = vpop.f32.mrf.mxu0  ;;  %6278 = vmatmul.mubr.msk.f32.vlgmr.msra.gmra.mxu1 %vm395_vm10, %v6927_v58  ;;  %6287 = vmatprep.subr.mxu1 %v6661_v1 }
 0x678   : > { %6288 = vmatpush3.msk.msra.mxu1 %vm6809_vm5, %v6663_v9  ;;  %6291 = vmatprep.mubr.msk.f32.mxu1 %vm6662_vm0, %v6661_v1 }
 0x679   : > { %6289 = vmatprep.subr.mxu1 %v6661_v1  ;;  %v3033_v4 = vpop.f32.mrf.mxu0 }
 0x67a   : > { %6290 = vmatpush3.msk.msra.mxu1 %vm6815_vm6, %v6663_v9 }
 0x67b   : > { %6292 = vmatmul.mubr.msk.f32.vlgmr.msra.gmra.mxu1 %vm252_vm8, %v2964_v59  ;;  %6299 = vmatprep.subr.mxu1 %v6661_v1  ;;  %v6286_v5 = vpop.f32.mrf.mxu0  ;;  %v3637_v59 = vsel %vm250_vm7, %v3636_v56, %v3635_v57 }
 0x67c   : > { %6301 = vmatprep.mubr.msk.f32.mxu1 %vm6662_vm0, %v6661_v1  ;;  %6300 = vmatpush3.msk.msra.mxu1 %vm399_vm9, %v3033_v4  ;;  %v3927_v4 = vld [vmem:[%s6779_s4 + $0x1b] sm:$0x1] }
 0x67d   : > { %6311 = vmatprep.subr.mxu1 %v6661_v1 }
 0x67f   : > { %6302 = vmatmul.mubr.msk.f32.vlgmr.msra.gmra.mxu1 %vm395_vm10, %v6854_v30 }
 0x680   : > { %6313 = vmatprep.mubr.msk.f32.mxu1 %vm6662_vm0, %v6661_v1 }
 0x733   : > { %v2735_v10 = vpop.f32.mrf.mxu1 }
 0x734   : > { %v2739_v18 = vadd.f32 %v2735_v10, %v2577_v15  ;;  %v3934_v10 = vrot.slane %v3927_v4, 7 }
 0x735   : > { %v6267_v17 = vpop.f32.mrf.mxu1 }
 0x736   : > { %v3929_v17 = vld [vmem:[%s6779_s4 + $0x3b] sm:$0x1]  ;;  %v3935_v22 = vsel %vm244_vm1, %v3934_v10, %v3926_v12  ;;  %v4601_v10 = vld [vmem:[%s6779_s4 + $0x2d] sm:$0x1] }
 0x737   : > { %v2879_v23 = vpop.f32.mrf.mxu1  ;;  %v3938_v24 = vrot.slane %v3929_v17, 5 }
 0x738   : > { %v2883_v25 = vadd.f32 %v2879_v23, %v2739_v18  ;;  %v3936_v18 = vrot.slane %v3928_v7, 6 }
 0x739   : > { %v6279_v26 = vpop.f32.mrf.mxu1 }
 0x73a   : > { %v2884_v28 = vadd.f32 %v2883_v25, %v6956_v19  ;;  %v3937_v26 = vsel %vm247_vm4, %v3936_v18, %v3935_v22  ;;  %v4602_v18 = vld [vmem:[%s6779_s4 + $0x3d] sm:$0x1] }
 0x73b   : > { %v3103_v32 = vpop.f32.mrf.mxu1 }
 0x73c   : > { %v2886_v2 = vcombine.high %v2884_v28, %v2884_v28  ;;  %v2893_v33 = vrot.slane %v2884_v28, %v6960_v21  ;;  %6295 = vmatpush3.msk.msra.mxu0 %vm399_vm9, %v3103_v32 }
 0x73d   : > { %v6293_v34 = vpop.f32.mrf.mxu1  ;;  %6297 = vmatmul.mubr.msk.f32.vlgmr.msra.gmra.mxu0 %vm395_vm10, %v6849_v29  ;;  %6304 = vmatprep.subr.mxu0 %v6661_v1 }
 0x73e   : > { %v2900_v36 = vrot.slane %v2886_v2, %v6960_v21  ;;  %v2901_v37 = vcombine.high %v2893_v33, %v2893_v33  ;;  %v2909_v38 = vrot.slane %v2893_v33, %v6960_v21  ;;  %6305 = vmatpush3.msk.msra.mxu0 %vm6794_vm2, %v6663_v9  ;;  %6308 = vmatprep.mubr.msk.f32.mxu0 %vm6662_vm0, %v6661_v1  ;;  %v7393_v2 = vld [vmem:[%s7754_s1 + $0x8] sm:$0xff] }
 0x73f   : > { %6306 = vmatprep.subr.mxu0 %v6661_v1  ;;  %v3249_v46 = vpop.f32.mrf.mxu1  ;;  %v3939_v33 = vsel %vm250_vm7, %v3938_v24, %v3937_v26 }
 0x740   : > { %v2902_v29 = vcombine.high %v2900_v36, %v2900_v36  ;;  %v2916_v39 = vrot.slane %v2900_v36, %v6960_v21  ;;  %v2923_v40 = vrot.slane %v2901_v37, %v6960_v21  ;;  %v2931_v41 = vcombine.high %v2909_v38, %v2909_v38  ;;  %2943 = vst.msk [vmem:[%s6982_s21 + $0x3] sm:$0x1] %vm923_vm11, %v2909_v38 }
 0x741   : > { %6307 = vmatpush3.msk.msra.mxu0 %vm6799_vm3, %v6663_v9  ;;  %v6303_v47 = vpop.f32.mrf.mxu1 }
 0x742   : > { %6309 = vmatmul.mubr.msk.f32.vlgmr.msra.gmra.mxu0 %vm252_vm8, %v3266_v35  ;;  %6316 = vmatprep.subr.mxu0 %v6661_v1  ;;  %v2930_v42 = vrot.slane %v2902_v29, %v6960_v21  ;;  %v2932_v43 = vcombine.high %v2916_v39, %v2916_v39  ;;  %v2933_v44 = vcombine.high %v2923_v40, %v2923_v40  ;;  %v4299_v47 = vld [vmem:[%s6779_s4 + $0x2c] sm:$0x1] }
 0x743   : > { %2944 = vst.msk [vmem:[%s6982_s21 + $0xb] sm:$0x1] %vm923_vm11, %v2923_v40  ;;  %2945 = vst.msk [vmem:[%s6982_s21 + $0x13] sm:$0x1] %vm923_vm11, %v2931_v41  ;;  %6317 = vmatpush3.msk.msra.mxu0 %vm6809_vm5, %v6663_v9  ;;  %6320 = vmatprep.mubr.msk.f32.mxu0 %vm6662_vm0, %v6661_v1  ;;  %v4307_v51 = vrot.slane %v4299_v47, 6 }
 0x744   : > { %2947 = vst.msk [vmem:[%s6982_s21 + $0x23] sm:$0x1] %vm923_vm11, %v2916_v39  ;;  %6318 = vmatprep.subr.mxu0 %v6661_v1  ;;  %v2934_v45 = vcombine.high %v2930_v42, %v2930_v42  ;;  %2946 = vst.msk [vmem:[%s6982_s21 + $0x1b] sm:$0x1] %vm923_vm11, %v2933_v44  ;;  %v4971_v47 = vld [vmem:[%s6779_s4 + $0x1e] sm:$0x1] }
 0x745   : > { %2948 = vst.msk [vmem:[%s6982_s21 + $0x2b] sm:$0x1] %vm923_vm11, %v2930_v42  ;;  %2949 = vst.msk [vmem:[%s6982_s21 + $0x33] sm:$0x1] %vm923_vm11, %v2932_v43  ;;  %6319 = vmatpush3.msk.msra.mxu0 %vm6815_vm6, %v6663_v9 }
 0x746   : > { %6321 = vmatmul.mubr.msk.f32.vlgmr.msra.gmra.mxu0 %vm252_vm8, %v3266_v35  ;;  %6328 = vmatprep.subr.mxu0 %v6661_v1  ;;  %2950 = vst.msk [vmem:[%s6982_s21 + $0x3b] sm:$0x1] %vm923_vm11, %v2934_v45 }
 0x747   : > { %6329 = vmatpush3.msk.msra.mxu0 %vm6794_vm2, %v6663_v9  ;;  %6332 = vmatprep.mubr.msk.f32.mxu0 %vm6662_vm0, %v6661_v1 }
 0x748   : > { %6330 = vmatprep.subr.mxu0 %v6661_v1 }
 0x749   : > { %6331 = vmatpush3.msk.msra.mxu0 %vm6799_vm3, %v6663_v9 }
 0x74a   : > { %6342 = vmatprep.subr.mxu0 %v6661_v1  ;;  %6333 = vmatmul.mubr.msk.f32.vlgmr.msra.gmra.mxu0 %vm252_vm8, %v3637_v59 }
 0x74b   : > { %6344 = vmatprep.mubr.msk.f32.mxu0 %vm6662_vm0, %v6661_v1 }
 0x7fd   : > { %v3176_v60 = vpop.f32.mrf.mxu0 }
 0x7fe   : > { %v3250_v11 = vadd.f32 %v3249_v46, %v3176_v60  ;;  %v4298_v46 = vld [vmem:[%s6779_s4 + $0x1c] sm:$0x1] }
 0x7ff   : > { %v6298_v61 = vpop.f32.mrf.mxu0  ;;  %v4305_v48 = vrot.slane %v4298_v46, 7 }
 0x801   : > { %v4306_v52 = vsel %vm244_vm1, %v4305_v48, %v4297_v49  ;;  %v4972_v48 = vld [vmem:[%s6779_s4 + $0x2e] sm:$0x1]  ;;  %v4978_v49 = vrot.slane %v4971_v47, 7 }
 0x802   : > { %v3335_v62 = vpop.f32.mrf.mxu0  ;;  %v4308_v54 = vsel %vm247_vm4, %v4307_v51, %v4306_v52  ;;  %v4973_v51 = vld [vmem:[%s6779_s4 + $0x3e] sm:$0x1]  ;;  %v4980_v52 = vrot.slane %v4972_v48, 6 }
 0x803   : > { %6312 = vmatpush3.msk.msra.mxu1 %vm399_vm9, %v3335_v62  ;;  %v4310_v56 = vsel %vm250_vm7, %v4309_v53, %v4308_v54  ;;  %v7466_v62 = vld [vmem:[%s7754_s1 + $0x10] sm:$0xff]  ;;  %v4979_v53 = vsel %vm244_vm1, %v4978_v49, %v4970_v50  ;;  %v4982_v54 = vrot.slane %v4973_v51, 5 }
 0x804   : > { %v6310_v63 = vpop.f32.mrf.mxu0  ;;  %6314 = vmatmul.mubr.msk.f32.vlgmr.msra.gmra.mxu1 %vm395_vm10, %v6916_v55  ;;  %6323 = vmatprep.subr.mxu1 %v6661_v1 }
 0x805   : > { %6325 = vmatprep.mubr.msk.f32.mxu1 %vm6662_vm0, %v6661_v1 }
 0x806   : > { %v3479_v0 = vpop.f32.mrf.mxu0 }
 0x807   : > { %6324 = vmatpush3.msk.msra.mxu1 %vm399_vm9, %v3479_v0 }
 0x808   : > { %v6322_v3 = vpop.f32.mrf.mxu0  ;;  %6326 = vmatmul.mubr.msk.f32.vlgmr.msra.gmra.mxu1 %vm395_vm10, %v6927_v58  ;;  %6335 = vmatprep.subr.mxu1 %v6661_v1 }
 0x809   : > { %6336 = vmatpush3.msk.msra.mxu1 %vm6809_vm5, %v6663_v9  ;;  %6339 = vmatprep.mubr.msk.f32.mxu1 %vm6662_vm0, %v6661_v1  ;;  %v7477_v3 = vld [vmem:[%s7754_s1 + $0x18] sm:$0xff] }
 0x80a   : > { %6337 = vmatprep.subr.mxu1 %v6661_v1  ;;  %v3706_v55 = vpop.f32.mrf.mxu0 }
 0x80b   : > { %6338 = vmatpush3.msk.msra.mxu1 %vm6815_vm6, %v6663_v9 }
 0x80c   : > { %6340 = vmatmul.mubr.msk.f32.vlgmr.msra.gmra.mxu1 %vm252_vm8, %v3637_v59  ;;  %6347 = vmatprep.subr.mxu1 %v6661_v1  ;;  %v6334_v58 = vpop.f32.mrf.mxu0 }
 0x80d   : > { %6349 = vmatprep.mubr.msk.f32.mxu1 %vm6662_vm0, %v6661_v1  ;;  %6348 = vmatpush3.msk.msra.mxu1 %vm399_vm9, %v3706_v55  ;;  %v7499_v58 = vld [vmem:[%s7754_s1] sm:$0xff] }
 0x80e   : > { %6359 = vmatprep.subr.mxu1 %v6661_v1 }
 0x810   : > { %6350 = vmatmul.mubr.msk.f32.vlgmr.msra.gmra.mxu1 %vm395_vm10, %v6854_v30 }
 0x811   : > { %6361 = vmatprep.mubr.msk.f32.mxu1 %vm6662_vm0, %v6661_v1 }
 0x8c4   : > { %v3408_v5 = vpop.f32.mrf.mxu1 }
 0x8c5   : > { %v3412_v16 = vadd.f32 %v3408_v5, %v3250_v11  ;;  %v4600_v5 = vld [vmem:[%s6779_s4 + $0x1d] sm:$0x1] }
 0x8c6   : > { %v6315_v15 = vpop.f32.mrf.mxu1  ;;  %v4607_v11 = vrot.slane %v4600_v5, 7 }
 0x8c7   : > { %v4599_v15 = vld [vmem:[%s6779_s4 + $0xd] sm:$0x1] }
 0x8c8   : > { %v3552_v20 = vpop.f32.mrf.mxu1 }
 0x8c9   : > { %v3556_v30 = vadd.f32 %v3552_v20, %v3412_v16  ;;  %v4609_v20 = vrot.slane %v4601_v10, 6 }
 0x8ca   : > { %v6327_v23 = vpop.f32.mrf.mxu1 }
 0x8cb   : > { %v3557_v25 = vadd.f32 %v3556_v30, %v6956_v19  ;;  %v4608_v30 = vsel %vm244_vm1, %v4607_v11, %v4599_v15  ;;  %v5274_v11 = vld [vmem:[%s6779_s4 + $0x2f] sm:$0x1] }
 0x8cc   : > { %v3776_v27 = vpop.f32.mrf.mxu1 }
 0x8cd   : > { %v3559_v28 = vcombine.high %v3557_v25, %v3557_v25  ;;  %v3566_v31 = vrot.slane %v3557_v25, %v6960_v21  ;;  %6343 = vmatpush3.msk.msra.mxu0 %vm399_vm9, %v3776_v27  ;;  %v4611_v25 = vrot.slane %v4602_v18, 5  ;;  %v4610_v27 = vsel %vm247_vm4, %v4609_v20, %v4608_v30  ;;  %v5275_v20 = vld [vmem:[%s6779_s4 + $0x3f] sm:$0x1] }
 0x8ce   : > { %v6341_v32 = vpop.f32.mrf.mxu1  ;;  %6345 = vmatmul.mubr.msk.f32.vlgmr.msra.gmra.mxu0 %vm395_vm10, %v7393_v2  ;;  %6352 = vmatprep.subr.mxu0 %v6661_v1 }
 0x8cf   : > { %v3573_v34 = vrot.slane %v3559_v28, %v6960_v21  ;;  %v3574_v35 = vcombine.high %v3566_v31, %v3566_v31  ;;  %v3582_v36 = vrot.slane %v3566_v31, %v6960_v21  ;;  %6353 = vmatpush3.msk.msra.mxu0 %vm6794_vm2, %v6663_v9  ;;  %6356 = vmatprep.mubr.msk.f32.mxu0 %vm6662_vm0, %v6661_v1 }
 0x8d0   : > { %6354 = vmatprep.subr.mxu0 %v6661_v1  ;;  %v3922_v44 = vpop.f32.mrf.mxu1 }
 0x8d1   : > { %v3575_v37 = vcombine.high %v3573_v34, %v3573_v34  ;;  %v3589_v38 = vrot.slane %v3573_v34, %v6960_v21  ;;  %v3596_v29 = vrot.slane %v3574_v35, %v6960_v21  ;;  %v3604_v39 = vcombine.high %v3582_v36, %v3582_v36  ;;  %3616 = vst.msk [vmem:[%s6982_s21 + $0x4] sm:$0x1] %vm923_vm11, %v3582_v36 }
 0x8d2   : > { %6355 = vmatpush3.msk.msra.mxu0 %vm6799_vm3, %v6663_v9  ;;  %v6351_v45 = vpop.f32.mrf.mxu1  ;;  %v4612_v34 = vsel %vm250_vm7, %v4611_v25, %v4610_v27  ;;  %v5284_v25 = vrot.slane %v5275_v20, 5 }
 0x8d3   : > { %6357 = vmatmul.mubr.msk.f32.vlgmr.msra.gmra.mxu0 %vm252_vm8, %v3939_v33  ;;  %6364 = vmatprep.subr.mxu0 %v6661_v1  ;;  %v3603_v40 = vrot.slane %v3575_v37, %v6960_v21  ;;  %v3605_v41 = vcombine.high %v3589_v38, %v3589_v38  ;;  %v3606_v42 = vcombine.high %v3596_v29, %v3596_v29 }
 0x8d4   : > { %3617 = vst.msk [vmem:[%s6982_s21 + $0xc] sm:$0x1] %vm923_vm11, %v3596_v29  ;;  %3618 = vst.msk [vmem:[%s6982_s21 + $0x14] sm:$0x1] %vm923_vm11, %v3604_v39  ;;  %6365 = vmatpush3.msk.msra.mxu0 %vm6809_vm5, %v6663_v9  ;;  %6368 = vmatprep.mubr.msk.f32.mxu0 %vm6662_vm0, %v6661_v1 }
 0x8d5   : > { %3620 = vst.msk [vmem:[%s6982_s21 + $0x24] sm:$0x1] %vm923_vm11, %v3589_v38  ;;  %6366 = vmatprep.subr.mxu0 %v6661_v1  ;;  %v3607_v43 = vcombine.high %v3603_v40, %v3603_v40  ;;  %3619 = vst.msk [vmem:[%s6982_s21 + $0x1c] sm:$0x1] %vm923_vm11, %v3606_v42 }
 0x8d6   : > { %3621 = vst.msk [vmem:[%s6982_s21 + $0x2c] sm:$0x1] %vm923_vm11, %v3603_v40  ;;  %3622 = vst.msk [vmem:[%s6982_s21 + $0x34] sm:$0x1] %vm923_vm11, %v3605_v41  ;;  %6367 = vmatpush3.msk.msra.mxu0 %vm6815_vm6, %v6663_v9 }
 0x8d7   : > { %6369 = vmatmul.mubr.msk.f32.vlgmr.msra.gmra.mxu0 %vm252_vm8, %v3939_v33  ;;  %6376 = vmatprep.subr.mxu0 %v6661_v1  ;;  %3623 = vst.msk [vmem:[%s6982_s21 + $0x3c] sm:$0x1] %vm923_vm11, %v3607_v43 }
 0x8d8   : > { %6377 = vmatpush3.msk.msra.mxu0 %vm6794_vm2, %v6663_v9  ;;  %6380 = vmatprep.mubr.msk.f32.mxu0 %vm6662_vm0, %v6661_v1 }
 0x8d9   : > { %6378 = vmatprep.subr.mxu0 %v6661_v1 }
 0x8da   : > { %6379 = vmatpush3.msk.msra.mxu0 %vm6799_vm3, %v6663_v9 }
 0x8db   : > { %6390 = vmatprep.subr.mxu0 %v6661_v1  ;;  %6381 = vmatmul.mubr.msk.f32.vlgmr.msra.gmra.mxu0 %vm252_vm8, %v4310_v56 }
 0x8dc   : > { %6392 = vmatprep.mubr.msk.f32.mxu0 %vm6662_vm0, %v6661_v1 }
 0x98e   : > { %v3849_v57 = vpop.f32.mrf.mxu0 }
 0x98f   : > { %v3923_v12 = vadd.f32 %v3922_v44, %v3849_v57 }
 0x990   : > { %v6346_v59 = vpop.f32.mrf.mxu0 }
 0x993   : > { %v4008_v60 = vpop.f32.mrf.mxu0 }
 0x994   : > { %6360 = vmatpush3.msk.msra.mxu1 %vm399_vm9, %v4008_v60 }
 0x995   : > { %v6358_v61 = vpop.f32.mrf.mxu0  ;;  %6362 = vmatmul.mubr.msk.f32.vlgmr.msra.gmra.mxu1 %vm395_vm10, %v7466_v62  ;;  %6371 = vmatprep.subr.mxu1 %v6661_v1 }
 0x996   : > { %6373 = vmatprep.mubr.msk.f32.mxu1 %vm6662_vm0, %v6661_v1 }
 0x997   : > { %v4152_v63 = vpop.f32.mrf.mxu0 }
 0x998   : > { %6372 = vmatpush3.msk.msra.mxu1 %vm399_vm9, %v4152_v63 }
 0x999   : > { %v6370_v0 = vpop.f32.mrf.mxu0  ;;  %6374 = vmatmul.mubr.msk.f32.vlgmr.msra.gmra.mxu1 %vm395_vm10, %v7477_v3  ;;  %6383 = vmatprep.subr.mxu1 %v6661_v1 }
 0x99a   : > { %6384 = vmatpush3.msk.msra.mxu1 %vm6809_vm5, %v6663_v9  ;;  %6387 = vmatprep.mubr.msk.f32.mxu1 %vm6662_vm0, %v6661_v1 }
 0x99b   : > { %6385 = vmatprep.subr.mxu1 %v6661_v1  ;;  %v4379_v55 = vpop.f32.mrf.mxu0 }
 0x99c   : > { %6386 = vmatpush3.msk.msra.mxu1 %vm6815_vm6, %v6663_v9 }
 0x99d   : > { %6388 = vmatmul.mubr.msk.f32.vlgmr.msra.gmra.mxu1 %vm252_vm8, %v4310_v56  ;;  %6395 = vmatprep.subr.mxu1 %v6661_v1  ;;  %v6382_v4 = vpop.f32.mrf.mxu0  ;;  %v4981_v56 = vsel %vm247_vm4, %v4980_v52, %v4979_v53 }
 0x99e   : > { %6397 = vmatprep.mubr.msk.f32.mxu1 %vm6662_vm0, %v6661_v1  ;;  %6396 = vmatpush3.msk.msra.mxu1 %vm399_vm9, %v4379_v55  ;;  %v4983_v57 = vsel %vm250_vm7, %v4982_v54, %v4981_v56 }
 0x99f   : > { %6407 = vmatprep.subr.mxu1 %v6661_v1 }
 0x9a1   : > { %6398 = vmatmul.mubr.msk.f32.vlgmr.msra.gmra.mxu1 %vm395_vm10, %v7499_v58 }
 0x9a2   : > { %6409 = vmatprep.mubr.msk.f32.mxu1 %vm6662_vm0, %v6661_v1 }
 0xa55   : > { %v4081_v7 = vpop.f32.mrf.mxu1 }
 0xa56   : > { %v4085_v17 = vadd.f32 %v4081_v7, %v3923_v12  ;;  %v5273_v7 = vld [vmem:[%s6779_s4 + $0x1f] sm:$0x1] }
 0xa57   : > { %v6363_v16 = vpop.f32.mrf.mxu1  ;;  %v5280_v12 = vrot.slane %v5273_v7, 7 }
 0xa58   : > { %v5272_v16 = vld [vmem:[%s6779_s4 + $0xf] sm:$0x1]  ;;  %s5927_s4 = sshll.u32 %s6648_s15, 10  ;;  %s5644_s15 = scalar_lea.sflag [#allocation4], %s6773_s28 }
 0xa59   : > { %v4225_v22 = vpop.f32.mrf.mxu1  ;;  %s7695_s11 = scalar_lea.hbm %s7756_s3, %s5927_s4 }
 0xa5a   : > { %v4229_v23 = vadd.f32 %v4225_v22, %v4085_v17  ;;  %v5282_v22 = vrot.slane %v5274_v11, 6 }
 0xa5b   : > { %v6375_v24 = vpop.f32.mrf.mxu1 }
 0xa5c   : > { %v4230_v26 = vadd.f32 %v4229_v23, %v6956_v19  ;;  %v5281_v23 = vsel %vm244_vm1, %v5280_v12, %v5272_v16 }
 0xa5d   : > { %v4449_v28 = vpop.f32.mrf.mxu1  ;;  %v5283_v27 = vsel %vm247_vm4, %v5282_v22, %v5281_v23 }
 0xa5e   : > { %v4232_v31 = vcombine.high %v4230_v26, %v4230_v26  ;;  %v4239_v32 = vrot.slane %v4230_v26, %v6960_v21  ;;  %6391 = vmatpush3.msk.msra.mxu0 %vm399_vm9, %v4449_v28 }
 0xa5f   : > { %v6389_v33 = vpop.f32.mrf.mxu1  ;;  %6393 = vmatmul.mubr.msk.f32.vlgmr.msra.gmra.mxu0 %vm395_vm10, %v7393_v2  ;;  %6400 = vmatprep.subr.mxu0 %v6661_v1 }
 0xa60   : > { %v4246_v35 = vrot.slane %v4232_v31, %v6960_v21  ;;  %v4247_v36 = vcombine.high %v4239_v32, %v4239_v32  ;;  %v4255_v37 = vrot.slane %v4239_v32, %v6960_v21  ;;  %6401 = vmatpush3.msk.msra.mxu0 %vm6794_vm2, %v6663_v9  ;;  %6404 = vmatprep.mubr.msk.f32.mxu0 %vm6662_vm0, %v6661_v1 }
 0xa61   : > { %6402 = vmatprep.subr.mxu0 %v6661_v1  ;;  %v4595_v45 = vpop.f32.mrf.mxu1 }
 0xa62   : > { %v4248_v38 = vcombine.high %v4246_v35, %v4246_v35  ;;  %v4262_v29 = vrot.slane %v4246_v35, %v6960_v21  ;;  %v4269_v39 = vrot.slane %v4247_v36, %v6960_v21  ;;  %v4277_v40 = vcombine.high %v4255_v37, %v4255_v37  ;;  %4289 = vst.msk [vmem:[%s6982_s21 + $0x5] sm:$0x1] %vm923_vm11, %v4255_v37 }
 0xa63   : > { %6403 = vmatpush3.msk.msra.mxu0 %vm6799_vm3, %v6663_v9  ;;  %v6399_v46 = vpop.f32.mrf.mxu1 }
 0xa64   : > { %6405 = vmatmul.mubr.msk.f32.vlgmr.msra.gmra.mxu0 %vm252_vm8, %v4612_v34  ;;  %6412 = vmatprep.subr.mxu0 %v6661_v1  ;;  %v4276_v41 = vrot.slane %v4248_v38, %v6960_v21  ;;  %v4278_v42 = vcombine.high %v4262_v29, %v4262_v29  ;;  %v4279_v43 = vcombine.high %v4269_v39, %v4269_v39 }
 0xa65   : > { %4290 = vst.msk [vmem:[%s6982_s21 + $0xd] sm:$0x1] %vm923_vm11, %v4269_v39  ;;  %4291 = vst.msk [vmem:[%s6982_s21 + $0x15] sm:$0x1] %vm923_vm11, %v4277_v40  ;;  %6413 = vmatpush3.msk.msra.mxu0 %vm6809_vm5, %v6663_v9  ;;  %6416 = vmatprep.mubr.msk.f32.mxu0 %vm6662_vm0, %v6661_v1 }
 0xa66   : > { %4293 = vst.msk [vmem:[%s6982_s21 + $0x25] sm:$0x1] %vm923_vm11, %v4262_v29  ;;  %6414 = vmatprep.subr.mxu0 %v6661_v1  ;;  %v4280_v44 = vcombine.high %v4276_v41, %v4276_v41  ;;  %4292 = vst.msk [vmem:[%s6982_s21 + $0x1d] sm:$0x1] %vm923_vm11, %v4279_v43 }
 0xa67   : > { %4294 = vst.msk [vmem:[%s6982_s21 + $0x2d] sm:$0x1] %vm923_vm11, %v4276_v41  ;;  %4295 = vst.msk [vmem:[%s6982_s21 + $0x35] sm:$0x1] %vm923_vm11, %v4278_v42  ;;  %6415 = vmatpush3.msk.msra.mxu0 %vm6815_vm6, %v6663_v9 }
 0xa68   : > { %6417 = vmatmul.mubr.msk.f32.vlgmr.msra.gmra.mxu0 %vm252_vm8, %v4612_v34  ;;  %6424 = vmatprep.subr.mxu0 %v6661_v1  ;;  %4296 = vst.msk [vmem:[%s6982_s21 + $0x3d] sm:$0x1] %vm923_vm11, %v4280_v44  ;;  %v5285_v34 = vsel %vm250_vm7, %v5284_v25, %v5283_v27 }
 0xa69   : > { %6425 = vmatpush3.msk.msra.mxu0 %vm6794_vm2, %v6663_v9  ;;  %6428 = vmatprep.mubr.msk.f32.mxu0 %vm6662_vm0, %v6661_v1 }
 0xa6a   : > { %6426 = vmatprep.subr.mxu0 %v6661_v1 }
 0xa6b   : > { %6427 = vmatpush3.msk.msra.mxu0 %vm6799_vm3, %v6663_v9 }
 0xa6c   : > { %6438 = vmatprep.subr.mxu0 %v6661_v1  ;;  %6429 = vmatmul.mubr.msk.f32.vlgmr.msra.gmra.mxu0 %vm252_vm8, %v4983_v57 }
 0xa6d   : > { %6440 = vmatprep.mubr.msk.f32.mxu0 %vm6662_vm0, %v6661_v1 }
 0xb1f   : > { %v4522_v59 = vpop.f32.mrf.mxu0 }
 0xb20   : > { %v4596_v15 = vadd.f32 %v4595_v45, %v4522_v59 }
 0xb21   : > { %v6394_v60 = vpop.f32.mrf.mxu0 }
 0xb24   : > { %v4681_v61 = vpop.f32.mrf.mxu0 }
 0xb25   : > { %6408 = vmatpush3.msk.msra.mxu1 %vm399_vm9, %v4681_v61 }
 0xb26   : > { %v6406_v63 = vpop.f32.mrf.mxu0  ;;  %6410 = vmatmul.mubr.msk.f32.vlgmr.msra.gmra.mxu1 %vm395_vm10, %v7466_v62  ;;  %6419 = vmatprep.subr.mxu1 %v6661_v1 }
 0xb27   : > { %6421 = vmatprep.mubr.msk.f32.mxu1 %vm6662_vm0, %v6661_v1 }
 0xb28   : > { %v4825_v0 = vpop.f32.mrf.mxu0 }
 0xb29   : > { %6420 = vmatpush3.msk.msra.mxu1 %vm399_vm9, %v4825_v0 }
 0xb2a   : > { %v6418_v55 = vpop.f32.mrf.mxu0  ;;  %6422 = vmatmul.mubr.msk.f32.vlgmr.msra.gmra.mxu1 %vm395_vm10, %v7477_v3  ;;  %6431 = vmatprep.subr.mxu1 %v6661_v1 }
 0xb2b   : > { %6432 = vmatpush3.msk.msra.mxu1 %vm6809_vm5, %v6663_v9  ;;  %6435 = vmatprep.mubr.msk.f32.mxu1 %vm6662_vm0, %v6661_v1 }
 0xb2c   : > { %6433 = vmatprep.subr.mxu1 %v6661_v1  ;;  %v5052_v4 = vpop.f32.mrf.mxu0 }
 0xb2d   : > { %6434 = vmatpush3.msk.msra.mxu1 %vm6815_vm6, %v6663_v9 }
 0xb2e   : > { %6436 = vmatmul.mubr.msk.f32.vlgmr.msra.gmra.mxu1 %vm252_vm8, %v4983_v57  ;;  %6443 = vmatprep.subr.mxu1 %v6661_v1  ;;  %v6430_v5 = vpop.f32.mrf.mxu0 }
 0xb2f   : > { %6445 = vmatprep.mubr.msk.f32.mxu1 %vm6662_vm0, %v6661_v1  ;;  %6444 = vmatpush3.msk.msra.mxu1 %vm399_vm9, %v5052_v4 }
 0xb30   : > { %6455 = vmatprep.subr.mxu1 %v6661_v1 }
 0xb32   : > { %6446 = vmatmul.mubr.msk.f32.vlgmr.msra.gmra.mxu1 %vm395_vm10, %v7499_v58 }
 0xb33   : > { %6457 = vmatprep.mubr.msk.f32.mxu1 %vm6662_vm0, %v6661_v1 }
 0xbe6   : > { %v4754_v10 = vpop.f32.mrf.mxu1 }
 0xbe7   : > { %v4758_v18 = vadd.f32 %v4754_v10, %v4596_v15 }
 0xbe8   : > { %v6411_v17 = vpop.f32.mrf.mxu1 }
 0xbea   : > { %v4898_v30 = vpop.f32.mrf.mxu1 }
 0xbeb   : > { %v4902_v58 = vadd.f32 %v4898_v30, %v4758_v18 }
 0xbec   : > { %v6423_v24 = vpop.f32.mrf.mxu1 }
 0xbed   : > { %v4903_v26 = vadd.f32 %v4902_v58, %v6956_v19 }
 0xbee   : > { %v5122_v28 = vpop.f32.mrf.mxu1 }
 0xbef   : > { %v4905_v31 = vcombine.high %v4903_v26, %v4903_v26  ;;  %v4912_v32 = vrot.slane %v4903_v26, %v6960_v21  ;;  %6439 = vmatpush3.msk.msra.mxu0 %vm399_vm9, %v5122_v28 }
 0xbf0   : > { %v6437_v33 = vpop.f32.mrf.mxu1  ;;  %6441 = vmatmul.mubr.msk.f32.vlgmr.msra.gmra.mxu0 %vm395_vm10, %v7393_v2  ;;  %6448 = vmatprep.subr.mxu0 %v6661_v1 }
 0xbf1   : > { %v4919_v35 = vrot.slane %v4905_v31, %v6960_v21  ;;  %v4920_v36 = vcombine.high %v4912_v32, %v4912_v32  ;;  %v4928_v37 = vrot.slane %v4912_v32, %v6960_v21  ;;  %6449 = vmatpush3.msk.msra.mxu0 %vm6794_vm2, %v6663_v9  ;;  %6452 = vmatprep.mubr.msk.f32.mxu0 %vm6662_vm0, %v6661_v1 }
 0xbf2   : > { %6450 = vmatprep.subr.mxu0 %v6661_v1  ;;  %v5268_v13 = vpop.f32.mrf.mxu1 }
 0xbf3   : > { %v4921_v2 = vcombine.high %v4919_v35, %v4919_v35  ;;  %v4935_v38 = vrot.slane %v4919_v35, %v6960_v21  ;;  %v4942_v29 = vrot.slane %v4920_v36, %v6960_v21  ;;  %v4950_v39 = vcombine.high %v4928_v37, %v4928_v37  ;;  %4962 = vst.msk [vmem:[%s6982_s21 + $0x6] sm:$0x1] %vm923_vm11, %v4928_v37 }
 0xbf4   : > { %6451 = vmatpush3.msk.msra.mxu0 %vm6799_vm3, %v6663_v9  ;;  %v6447_v42 = vpop.f32.mrf.mxu1 }
 0xbf5   : > { %6453 = vmatmul.mubr.msk.f32.vlgmr.msra.gmra.mxu0 %vm252_vm8, %v5285_v34  ;;  %6460 = vmatprep.subr.mxu0 %v6661_v1  ;;  %v4949_v6 = vrot.slane %v4921_v2, %v6960_v21  ;;  %v4951_v40 = vcombine.high %v4935_v38, %v4935_v38  ;;  %v4952_v41 = vcombine.high %v4942_v29, %v4942_v29 }
 0xbf6   : > { %4963 = vst.msk [vmem:[%s6982_s21 + $0xe] sm:$0x1] %vm923_vm11, %v4942_v29  ;;  %4964 = vst.msk [vmem:[%s6982_s21 + $0x16] sm:$0x1] %vm923_vm11, %v4950_v39  ;;  %6461 = vmatpush3.msk.msra.mxu0 %vm6809_vm5, %v6663_v9  ;;  %6464 = vmatprep.mubr.msk.f32.mxu0 %vm6662_vm0, %v6661_v1 }
 0xbf7   : > { %4966 = vst.msk [vmem:[%s6982_s21 + $0x26] sm:$0x1] %vm923_vm11, %v4935_v38  ;;  %6462 = vmatprep.subr.mxu0 %v6661_v1  ;;  %v4953_v8 = vcombine.high %v4949_v6, %v4949_v6  ;;  %4965 = vst.msk [vmem:[%s6982_s21 + $0x1e] sm:$0x1] %vm923_vm11, %v4952_v41 }
 0xbf8   : > { %4967 = vst.msk [vmem:[%s6982_s21 + $0x2e] sm:$0x1] %vm923_vm11, %v4949_v6  ;;  %4968 = vst.msk [vmem:[%s6982_s21 + $0x36] sm:$0x1] %vm923_vm11, %v4951_v40  ;;  %6463 = vmatpush3.msk.msra.mxu0 %vm6815_vm6, %v6663_v9 }
 0xbf9   : > { %6465 = vmatmul.mubr.msk.f32.vlgmr.msra.gmra.mxu0 %vm252_vm8, %v5285_v34  ;;  %4969 = vst.msk [vmem:[%s6982_s21 + $0x3e] sm:$0x1] %vm923_vm11, %v4953_v8 }
 0xcb0   : > { %v5195_v43 = vpop.f32.mrf.mxu0 }
 0xcb1   : > { %v5269_v48 = vadd.f32 %v5268_v13, %v5195_v43 }
 0xcb2   : > { %v6442_v44 = vpop.f32.mrf.mxu0 }
 0xcb5   : > { %v5354_v45 = vpop.f32.mrf.mxu0 }
 0xcb6   : > { %6456 = vmatpush3.msk.msra.mxu1 %vm399_vm9, %v5354_v45 }
 0xcb7   : > { %v6454_v46 = vpop.f32.mrf.mxu0  ;;  %6458 = vmatmul.mubr.msk.f32.vlgmr.msra.gmra.mxu1 %vm395_vm10, %v7466_v62  ;;  %6467 = vmatprep.subr.mxu1 %v6661_v1 }
 0xcb8   : > { %6469 = vmatprep.mubr.msk.f32.mxu1 %vm6662_vm0, %v6661_v1 }
 0xcb9   : > { %v5498_v9 = vpop.f32.mrf.mxu0 }
 0xcba   : > { %6468 = vmatpush3.msk.msra.mxu1 %vm399_vm9, %v5498_v9 }
 0xcbb   : > { %v6466_v14 = vpop.f32.mrf.mxu0  ;;  %6470 = vmatmul.mubr.msk.f32.vlgmr.msra.gmra.mxu1 %vm395_vm10, %v7477_v3 }
 0xd77   : > { %v5427_v47 = vpop.f32.mrf.mxu1 }
 0xd78   : > { %v5431_v50 = vadd.f32 %v5427_v47, %v5269_v48 }
 0xd79   : > { %v6459_v49 = vpop.f32.mrf.mxu1 }
 0xd7b   : > { %v5571_v62 = vpop.f32.mrf.mxu1 }
 0xd7c   : > { %v5575_v51 = vadd.f32 %v5571_v62, %v5431_v50 }
 0xd7d   : > { %v6471_v52 = vpop.f32.mrf.mxu1 }
 0xd7e   : > { %v5576_v53 = vadd.f32 %v5575_v51, %v6956_v19 }
 0xd80   : > { %v5578_v1 = vcombine.high %v5576_v53, %v5576_v53  ;;  %v5585_v54 = vrot.slane %v5576_v53, %v6960_v21 }
 0xd82   : > { %v5592_v3 = vrot.slane %v5578_v1, %v6960_v21  ;;  %v5593_v56 = vcombine.high %v5585_v54, %v5585_v54  ;;  %v5601_v57 = vrot.slane %v5585_v54, %v6960_v21 }
 0xd84   : > { %v5594_v59 = vcombine.high %v5592_v3, %v5592_v3  ;;  %v5608_v60 = vrot.slane %v5592_v3, %v6960_v21  ;;  %v5615_v61 = vrot.slane %v5593_v56, %v6960_v21  ;;  %v5623_v19 = vcombine.high %v5601_v57, %v5601_v57  ;;  %5635 = vst.msk [vmem:[%s6982_s21 + $0x7] sm:$0x1] %vm923_vm11, %v5601_v57 }
 0xd86   : > { %v5622_v63 = vrot.slane %v5594_v59, %v6960_v21  ;;  %v5624_v0 = vcombine.high %v5608_v60, %v5608_v60  ;;  %v5625_v55 = vcombine.high %v5615_v61, %v5615_v61  ;;  %5636 = vst.msk [vmem:[%s6982_s21 + $0xf] sm:$0x1] %vm923_vm11, %v5615_v61  ;;  %5637 = vst.msk [vmem:[%s6982_s21 + $0x17] sm:$0x1] %vm923_vm11, %v5623_v19 }
 0xd87   : > { %5639 = vst.msk [vmem:[%s6982_s21 + $0x27] sm:$0x1] %vm923_vm11, %v5608_v60 }
 0xd88   : > { %v5626_v21 = vcombine.high %v5622_v63, %v5622_v63  ;;  %5638 = vst.msk [vmem:[%s6982_s21 + $0x1f] sm:$0x1] %vm923_vm11, %v5625_v55  ;;  %5640 = vst.msk [vmem:[%s6982_s21 + $0x2f] sm:$0x1] %vm923_vm11, %v5622_v63 }
 0xd89   : > { %5641 = vst.msk [vmem:[%s6982_s21 + $0x37] sm:$0x1] %vm923_vm11, %v5624_v0 }
 0xd8a   : > { %5642 = vst.msk [vmem:[%s6982_s21 + $0x3f] sm:$0x1] %vm923_vm11, %v5626_v21 }
 0xd8b   : > { %6589 = shalt.err (!%p6586_p6)
}
 0xd8c   : > { %s6590_s21 = scalar_lea.hbm %s7695_s11, 1024  ;;  %s6594_s24 = scalar_lea.hbm %s7756_s3, 2048 }
 0xd8d   : > { %p6591_p7 = scmp.ne.s32.totalorder %s7695_s11, %s6590_s21  ;;  %p6595_p13 = scmp.lt.s32.totalorder %s7695_s11, %s7756_s3 }
 0xd8e   : > { %p6596_p2 = scmp.lt.s32.totalorder %s6594_s24, %s6590_s21 }
 0xd8f   : > { %p6592_p10 = pnand %p6591_p7, %p6740_p9 }
 0xd90   : > { %p6597_p8 = por %p6596_p2, %p6595_p13 }
 0xd91   : > { %p6593_p4 = pneg %p6592_p10 }
 0xd93   : > { %p6598_p12 = pnand %p6597_p8, %p6593_p4 }
 0xd95   : > { %6601 = shalt.err (!%p6598_p12)
}
 0xd96   : > { %s6667_s7 = smov 128   ;;  %s6668_s4 = smov 8  }
 0xd97   : > { %6474 = dma.vmem_to_hbm [thread:$0]  (%p6740_p9), %s7697_s8, 1024, %s7695_s11, %s5644_s15, %s6667_s7, %s6667_s7, %s6668_s4  }
 0xd98 PF: > { %s5673_s9 = sand.u32 1, %s6636_s12   ;;  %p7770_p0 = scmp.ge.s32.totalorder %s6656_s17, 2 }
 0xd99   : > { %s5674_s10 = scalar_lea.sflag [#allocation4], %s5673_s9 }
 0xd9a   : > { %p6481_p1 = pnand %p7770_p0, %p6747_p11 }
 0xd9c   : > { %p6482_p3 = pneg %p6481_p1 }
 0xd9e   : > { %6631 = dma.done.wait (%p6482_p3), %s5674_s10, 1024  }
 0xd9f   : > { %6633 = vsyncadd (%p6482_p3), %s5674_s10, 4294966272  ;;  %s19_s17 = sadd.s32 1, %s6656_s17   ;;  %s7771_s12 = smov %s6640_s13 }
 0xda0   : > { %p16_p5 = scmp.ge.s32.totalorder %s19_s17, 4   ;;  %s7772_s13 = smov %s6644_s14 }
 0xda1   : > { %s7773_s14 = smov %s6745_s26  ;;  %s7774_s15 = smov %s6652_s16 }
 0xda2   : > { %s7775_s16 = smov %s7777_s20  ;;  %18 = sbr.rel (!%p16_p5) target bundleno = 6 (0x6), region = 80 }
 0xda7   :  { %5679 = vsyncpa [#allocation3], 1 }
 0xda8   :  { %5681 = vsyncpa [#allocation3 + $0x1], 1 }
 0xda9   :  { %5682 = vsyncpa [#allocation4], 1 }
 0xdaa   :  { %5684 = vsyncpa [#allocation4 + $0x1], 1 }

</bundles_post_ra>
